<compile_context>
chip_gen: v7x
topology: tpu7x:2x2x1
jax: 0.10.0
libtpu: 0.0.40
codegen_flags: <defaults>
</compile_context>

<pallas_src>
import functools

import jax
import jax.numpy as jnp
from jax import lax
from jax.experimental import pallas as pl
from jax.experimental.pallas import tpu as pltpu


def gru_kernel(x_ref, uf_ref, wf_ref, bf_ref, out_ref, proj_ref):
    S, GP = out_ref.shape  # GP = per-gate lane width (hidden padded to 128 lanes)

    # Fused, lane-padded input projection, staged in VMEM scratch:
    # [S, E] @ [E, 3*GP] + [1, 3*GP] -> [S, 3*GP].
    proj_ref[...] = (
        jnp.dot(x_ref[...], uf_ref[...], preferred_element_type=jnp.float32)
        + bf_ref[...]
    )

    def step(i, h):
        p = proj_ref[pl.ds(i, 1), :]                                    # [1, 3*GP]
        hw = jnp.dot(h, wf_ref[...], preferred_element_type=jnp.float32)  # [1, 3*GP]
        # vreg-aligned lane slices (GP == 128): no cross-lane rotates needed.
        u = jax.nn.sigmoid(p[:, 0:GP] + hw[:, 0:GP])
        r = jax.nn.sigmoid(p[:, GP:2 * GP] + hw[:, GP:2 * GP])
        cand = jax.nn.sigmoid(p[:, 2 * GP:3 * GP] + r * hw[:, 2 * GP:3 * GP])
        h = u * h + (1.0 - u) * cand
        out_ref[pl.ds(i, 1), :] = h          # lane-dense store, off critical path
        return h

    unroll = True if S <= 16 else 8
    lax.fori_loop(0, S, step, jnp.zeros((1, GP), jnp.float32), unroll=unroll)


def fuse_gru_params(params, dtype=jnp.float32, lane=128):
    """One-time host-side prep: transpose, fuse the 3 gates along lanes, and
    zero-pad each gate slab (and the hidden dim) to a multiple of 128 lanes."""
    H, _ = params["Uu"].shape
    GP = ((H + lane - 1) // lane) * lane

    def pad_in(m):    # [H, E] -> [E, GP]
        return jnp.pad(m.T, ((0, 0), (0, GP - H)))

    def pad_rec(m):   # [H, H] -> [GP, GP]  (padded rows are zero -> no contamination)
        return jnp.pad(m.T, ((0, GP - H), (0, GP - H)))

    def pad_b(b):     # [H] -> [GP]
        return jnp.pad(b, (0, GP - H))

    uf = jnp.concatenate(
        [pad_in(params["Uu"]), pad_in(params["Ur"]), pad_in(params["U"])],
        axis=1).astype(dtype)                                   # [E, 3*GP]
    wf = jnp.concatenate(
        [pad_rec(params["Wu"]), pad_rec(params["Wr"]), pad_rec(params["W"])],
        axis=1).astype(dtype)                                   # [GP, 3*GP]
    bf = jnp.concatenate(
        [pad_b(params["Bu"]), pad_b(params["Br"]), pad_b(params["B"])]
    ).reshape(1, 3 * GP).astype(jnp.float32)                    # [1, 3*GP]
    return uf, wf, bf


@functools.partial(jax.jit, static_argnames=("hidden_dim",))
def gru_forward(x, uf, wf, bf, *, hidden_dim):
    """x: [seq, embed]; uf/wf/bf: pre-fused, lane-padded weights."""
    S = x.shape[0]
    GP = wf.shape[0]
    vmem = pl.BlockSpec(memory_space=pltpu.MemorySpace.VMEM)
    out_padded = pl.pallas_call(
        gru_kernel,
        out_shape=jax.ShapeDtypeStruct((S, GP), jnp.float32),
        in_specs=[vmem, vmem, vmem, vmem],
        out_specs=vmem,
        scratch_shapes=[pltpu.VMEM((S, 3 * GP), jnp.float32)],
    )(x.astype(jnp.float32), uf, wf, bf)
    outputs = out_padded[:, :hidden_dim]     # free wrapper-side layout plumbing
    return outputs[-1], outputs


def gru_reference(x, params):
    """Pure-JAX reference mirroring the PyTorch forward (f32)."""
    H = params["Bu"].shape[0]
    h = jnp.zeros((H,), jnp.float32)
    outs = []
    for i in range(x.shape[0]):
        u = jax.nn.sigmoid(params["Uu"] @ x[i] + params["Wu"] @ h + params["Bu"])
        r = jax.nn.sigmoid(params["Ur"] @ x[i] + params["Wr"] @ h + params["Br"])
        cand = jax.nn.sigmoid(params["U"] @ x[i] + r * (params["W"] @ h) + params["B"])
        h = u * h + (1.0 - u) * cand
        outs.append(h)
    return h, jnp.stack(outs)


if __name__ == "__main__":
    embed_dim, hidden_dim, seq = 16, 32, 8

    key = jax.random.PRNGKey(0)
    ks = jax.random.split(key, 10)
    # torch.rand -> uniform [0, 1)
    params = {
        "Uu": jax.random.uniform(ks[0], (hidden_dim, embed_dim), jnp.float32),
        "Wu": jax.random.uniform(ks[1], (hidden_dim, hidden_dim), jnp.float32),
        "Bu": jax.random.uniform(ks[2], (hidden_dim,), jnp.float32),
        "Ur": jax.random.uniform(ks[3], (hidden_dim, embed_dim), jnp.float32),
        "Wr": jax.random.uniform(ks[4], (hidden_dim, hidden_dim), jnp.float32),
        "Br": jax.random.uniform(ks[5], (hidden_dim,), jnp.float32),
        "U":  jax.random.uniform(ks[6], (hidden_dim, embed_dim), jnp.float32),
        "W":  jax.random.uniform(ks[7], (hidden_dim, hidden_dim), jnp.float32),
        "B":  jax.random.uniform(ks[8], (hidden_dim,), jnp.float32),
    }
    x = jax.random.uniform(ks[9], (seq, embed_dim), jnp.float32)

    # Hoisted, one-time weight prep (not repeated per forward call).
    uf, wf, bf = fuse_gru_params(params)
    uf, wf, bf = jax.block_until_ready((uf, wf, bf))

    h_final, outputs = gru_forward(x, uf, wf, bf, hidden_dim=hidden_dim)
    jax.block_until_ready((h_final, outputs))

    h_ref, out_ref = gru_reference(x, params)
    assert jnp.allclose(h_final, h_ref, atol=1e-5, rtol=1e-5)
    assert jnp.allclose(outputs, out_ref, atol=1e-5, rtol=1e-5)

    print("KERNEL_OK")
</pallas_src>

<mosaic_0001>
module attributes {stable_mosaic.version = 11 : i64} {
  func.func @gru_kernel(%arg0: memref<8x16xf32, #tpu.memory_space<vmem>>, %arg1: memref<16x384xf32, #tpu.memory_space<vmem>>, %arg2: memref<128x384xf32, #tpu.memory_space<vmem>>, %arg3: memref<1x384xf32, #tpu.memory_space<vmem>>, %arg4: memref<8x128xf32, #tpu.memory_space<vmem>>, %arg5: memref<8x384xf32, #tpu.memory_space<vmem>>) attributes {dimension_semantics = [], scalar_prefetch = 0 : i64, scratch_operands = 1 : i64, tpu.core_type = #tpu.core_type<tc>} {
    %c0 = arith.constant 0 : index
    %c0_0 = arith.constant 0 : index
    %0 = vector.load %arg0[%c0, %c0_0] : memref<8x16xf32, #tpu.memory_space<vmem>>, vector<8x16xf32>
    %c0_1 = arith.constant 0 : index
    %c0_2 = arith.constant 0 : index
    %1 = vector.load %arg1[%c0_1, %c0_2] : memref<16x384xf32, #tpu.memory_space<vmem>>, vector<16x384xf32>
    %cst = arith.constant dense<0.000000e+00> : vector<8x384xf32>
    %2 = tpu.matmul %0, %1, %cst {dimension_numbers = #tpu.dot_dimension_numbers<[1], [0], [0], [1], [0, 0, 1, 1], [], []>} : vector<8x16xf32>, vector<16x384xf32>, vector<8x384xf32> -> vector<8x384xf32>
    %c0_3 = arith.constant 0 : index
    %c0_4 = arith.constant 0 : index
    %3 = vector.load %arg3[%c0_3, %c0_4] : memref<1x384xf32, #tpu.memory_space<vmem>>, vector<1x384xf32>
    %4 = vector.broadcast %3 : vector<1x384xf32> to vector<8x384xf32>
    %5 = arith.addf %2, %4 : vector<8x384xf32>
    %c0_5 = arith.constant 0 : index
    %c0_6 = arith.constant 0 : index
    %6 = vector.load %arg5[%c0_5, %c0_6] : memref<8x384xf32, #tpu.memory_space<vmem>>, vector<8x384xf32>
    tpu.vector_store %arg5[%c0_5, %c0_6], %5 {strides = array<i32>} : memref<8x384xf32, #tpu.memory_space<vmem>>, vector<8x384xf32>,
    %cst_7 = arith.constant 0.000000e+00 : f32
    %7 = vector.broadcast %cst_7 : f32 to vector<1x128xf32>
    %c0_i32 = arith.constant 0 : i32
    %8 = arith.index_cast %c0_i32 : i32 to index
    %c0_8 = arith.constant 0 : index
    %9 = vector.load %arg5[%8, %c0_8] : memref<8x384xf32, #tpu.memory_space<vmem>>, vector<1x384xf32>
    %c0_9 = arith.constant 0 : index
    %c0_10 = arith.constant 0 : index
    %10 = vector.load %arg2[%c0_9, %c0_10] : memref<128x384xf32, #tpu.memory_space<vmem>>, vector<128x384xf32>
    %cst_11 = arith.constant dense<0.000000e+00> : vector<1x384xf32>
    %11 = tpu.matmul %7, %10, %cst_11 {dimension_numbers = #tpu.dot_dimension_numbers<[1], [0], [0], [1], [0, 0, 1, 1], [], []>} : vector<1x128xf32>, vector<128x384xf32>, vector<1x384xf32> -> vector<1x384xf32>
    %12 = vector.extract_strided_slice %9 {offsets = [0, 0], sizes = [1, 128], strides = [1, 1]} : vector<1x384xf32> to vector<1x128xf32>
    %13 = vector.extract_strided_slice %11 {offsets = [0, 0], sizes = [1, 128], strides = [1, 1]} : vector<1x384xf32> to vector<1x128xf32>
    %14 = arith.addf %12, %13 : vector<1x128xf32>
    %15 = arith.negf %14 : vector<1x128xf32>
    %16 = math.exp %15 : vector<1x128xf32>
    %cst_12 = arith.constant 1.000000e+00 : f32
    %17 = vector.broadcast %cst_12 : f32 to vector<1x128xf32>
    %18 = arith.addf %17, %16 : vector<1x128xf32>
    %19 = arith.divf %17, %18 : vector<1x128xf32>
    %20 = vector.extract_strided_slice %9 {offsets = [0, 128], sizes = [1, 128], strides = [1, 1]} : vector<1x384xf32> to vector<1x128xf32>
    %21 = vector.extract_strided_slice %11 {offsets = [0, 128], sizes = [1, 128], strides = [1, 1]} : vector<1x384xf32> to vector<1x128xf32>
    %22 = arith.addf %20, %21 : vector<1x128xf32>
    %23 = arith.negf %22 : vector<1x128xf32>
    %24 = math.exp %23 : vector<1x128xf32>
    %cst_13 = arith.constant 1.000000e+00 : f32
    %25 = vector.broadcast %cst_13 : f32 to vector<1x128xf32>
    %26 = arith.addf %25, %24 : vector<1x128xf32>
    %27 = arith.divf %25, %26 : vector<1x128xf32>
    %28 = vector.extract_strided_slice %9 {offsets = [0, 256], sizes = [1, 128], strides = [1, 1]} : vector<1x384xf32> to vector<1x128xf32>
    %29 = vector.extract_strided_slice %11 {offsets = [0, 256], sizes = [1, 128], strides = [1, 1]} : vector<1x384xf32> to vector<1x128xf32>
    %30 = arith.mulf %27, %29 : vector<1x128xf32>
    %31 = arith.addf %28, %30 : vector<1x128xf32>
    %32 = arith.negf %31 : vector<1x128xf32>
    %33 = math.exp %32 : vector<1x128xf32>
    %cst_14 = arith.constant 1.000000e+00 : f32
    %34 = vector.broadcast %cst_14 : f32 to vector<1x128xf32>
    %35 = arith.addf %34, %33 : vector<1x128xf32>
    %36 = arith.divf %34, %35 : vector<1x128xf32>
    %37 = arith.mulf %19, %7 : vector<1x128xf32>
    %cst_15 = arith.constant 1.000000e+00 : f32
    %38 = vector.broadcast %cst_15 : f32 to vector<1x128xf32>
    %39 = arith.subf %38, %19 : vector<1x128xf32>
    %40 = arith.mulf %39, %36 : vector<1x128xf32>
    %41 = arith.addf %37, %40 : vector<1x128xf32>
    %42 = arith.index_cast %c0_i32 : i32 to index
    %c0_16 = arith.constant 0 : index
    %43 = vector.load %arg4[%42, %c0_16] : memref<8x128xf32, #tpu.memory_space<vmem>>, vector<1x128xf32>
    tpu.vector_store %arg4[%42, %c0_16], %41 {strides = array<i32>} : memref<8x128xf32, #tpu.memory_space<vmem>>, vector<1x128xf32>,
    %c1_i32 = arith.constant 1 : i32
    %44 = arith.index_cast %c1_i32 : i32 to index
    %c0_17 = arith.constant 0 : index
    %45 = vector.load %arg5[%44, %c0_17] : memref<8x384xf32, #tpu.memory_space<vmem>>, vector<1x384xf32>
    %c0_18 = arith.constant 0 : index
    %c0_19 = arith.constant 0 : index
    %46 = vector.load %arg2[%c0_18, %c0_19] : memref<128x384xf32, #tpu.memory_space<vmem>>, vector<128x384xf32>
    %cst_20 = arith.constant dense<0.000000e+00> : vector<1x384xf32>
    %47 = tpu.matmul %41, %46, %cst_20 {dimension_numbers = #tpu.dot_dimension_numbers<[1], [0], [0], [1], [0, 0, 1, 1], [], []>} : vector<1x128xf32>, vector<128x384xf32>, vector<1x384xf32> -> vector<1x384xf32>
    %48 = vector.extract_strided_slice %45 {offsets = [0, 0], sizes = [1, 128], strides = [1, 1]} : vector<1x384xf32> to vector<1x128xf32>
    %49 = vector.extract_strided_slice %47 {offsets = [0, 0], sizes = [1, 128], strides = [1, 1]} : vector<1x384xf32> to vector<1x128xf32>
    %50 = arith.addf %48, %49 : vector<1x128xf32>
    %51 = arith.negf %50 : vector<1x128xf32>
    %52 = math.exp %51 : vector<1x128xf32>
    %cst_21 = arith.constant 1.000000e+00 : f32
    %53 = vector.broadcast %cst_21 : f32 to vector<1x128xf32>
    %54 = arith.addf %53, %52 : vector<1x128xf32>
    %55 = arith.divf %53, %54 : vector<1x128xf32>
    %56 = vector.extract_strided_slice %45 {offsets = [0, 128], sizes = [1, 128], strides = [1, 1]} : vector<1x384xf32> to vector<1x128xf32>
    %57 = vector.extract_strided_slice %47 {offsets = [0, 128], sizes = [1, 128], strides = [1, 1]} : vector<1x384xf32> to vector<1x128xf32>
    %58 = arith.addf %56, %57 : vector<1x128xf32>
    %59 = arith.negf %58 : vector<1x128xf32>
    %60 = math.exp %59 : vector<1x128xf32>
    %cst_22 = arith.constant 1.000000e+00 : f32
    %61 = vector.broadcast %cst_22 : f32 to vector<1x128xf32>
    %62 = arith.addf %61, %60 : vector<1x128xf32>
    %63 = arith.divf %61, %62 : vector<1x128xf32>
    %64 = vector.extract_strided_slice %45 {offsets = [0, 256], sizes = [1, 128], strides = [1, 1]} : vector<1x384xf32> to vector<1x128xf32>
    %65 = vector.extract_strided_slice %47 {offsets = [0, 256], sizes = [1, 128], strides = [1, 1]} : vector<1x384xf32> to vector<1x128xf32>
    %66 = arith.mulf %63, %65 : vector<1x128xf32>
    %67 = arith.addf %64, %66 : vector<1x128xf32>
    %68 = arith.negf %67 : vector<1x128xf32>
    %69 = math.exp %68 : vector<1x128xf32>
    %cst_23 = arith.constant 1.000000e+00 : f32
    %70 = vector.broadcast %cst_23 : f32 to vector<1x128xf32>
    %71 = arith.addf %70, %69 : vector<1x128xf32>
    %72 = arith.divf %70, %71 : vector<1x128xf32>
    %73 = arith.mulf %55, %41 : vector<1x128xf32>
    %cst_24 = arith.constant 1.000000e+00 : f32
    %74 = vector.broadcast %cst_24 : f32 to vector<1x128xf32>
    %75 = arith.subf %74, %55 : vector<1x128xf32>
    %76 = arith.mulf %75, %72 : vector<1x128xf32>
    %77 = arith.addf %73, %76 : vector<1x128xf32>
    %78 = arith.index_cast %c1_i32 : i32 to index
    %c0_25 = arith.constant 0 : index
    %79 = vector.load %arg4[%78, %c0_25] : memref<8x128xf32, #tpu.memory_space<vmem>>, vector<1x128xf32>
    tpu.vector_store %arg4[%78, %c0_25], %77 {strides = array<i32>} : memref<8x128xf32, #tpu.memory_space<vmem>>, vector<1x128xf32>,
    %c2_i32 = arith.constant 2 : i32
    %80 = arith.index_cast %c2_i32 : i32 to index
    %c0_26 = arith.constant 0 : index
    %81 = vector.load %arg5[%80, %c0_26] : memref<8x384xf32, #tpu.memory_space<vmem>>, vector<1x384xf32>
    %c0_27 = arith.constant 0 : index
    %c0_28 = arith.constant 0 : index
    %82 = vector.load %arg2[%c0_27, %c0_28] : memref<128x384xf32, #tpu.memory_space<vmem>>, vector<128x384xf32>
    %cst_29 = arith.constant dense<0.000000e+00> : vector<1x384xf32>
    %83 = tpu.matmul %77, %82, %cst_29 {dimension_numbers = #tpu.dot_dimension_numbers<[1], [0], [0], [1], [0, 0, 1, 1], [], []>} : vector<1x128xf32>, vector<128x384xf32>, vector<1x384xf32> -> vector<1x384xf32>
    %84 = vector.extract_strided_slice %81 {offsets = [0, 0], sizes = [1, 128], strides = [1, 1]} : vector<1x384xf32> to vector<1x128xf32>
    %85 = vector.extract_strided_slice %83 {offsets = [0, 0], sizes = [1, 128], strides = [1, 1]} : vector<1x384xf32> to vector<1x128xf32>
    %86 = arith.addf %84, %85 : vector<1x128xf32>
    %87 = arith.negf %86 : vector<1x128xf32>
    %88 = math.exp %87 : vector<1x128xf32>
    %cst_30 = arith.constant 1.000000e+00 : f32
    %89 = vector.broadcast %cst_30 : f32 to vector<1x128xf32>
    %90 = arith.addf %89, %88 : vector<1x128xf32>
    %91 = arith.divf %89, %90 : vector<1x128xf32>
    %92 = vector.extract_strided_slice %81 {offsets = [0, 128], sizes = [1, 128], strides = [1, 1]} : vector<1x384xf32> to vector<1x128xf32>
    %93 = vector.extract_strided_slice %83 {offsets = [0, 128], sizes = [1, 128], strides = [1, 1]} : vector<1x384xf32> to vector<1x128xf32>
    %94 = arith.addf %92, %93 : vector<1x128xf32>
    %95 = arith.negf %94 : vector<1x128xf32>
    %96 = math.exp %95 : vector<1x128xf32>
    %cst_31 = arith.constant 1.000000e+00 : f32
    %97 = vector.broadcast %cst_31 : f32 to vector<1x128xf32>
    %98 = arith.addf %97, %96 : vector<1x128xf32>
    %99 = arith.divf %97, %98 : vector<1x128xf32>
    %100 = vector.extract_strided_slice %81 {offsets = [0, 256], sizes = [1, 128], strides = [1, 1]} : vector<1x384xf32> to vector<1x128xf32>
    %101 = vector.extract_strided_slice %83 {offsets = [0, 256], sizes = [1, 128], strides = [1, 1]} : vector<1x384xf32> to vector<1x128xf32>
    %102 = arith.mulf %99, %101 : vector<1x128xf32>
    %103 = arith.addf %100, %102 : vector<1x128xf32>
    %104 = arith.negf %103 : vector<1x128xf32>
    %105 = math.exp %104 : vector<1x128xf32>
    %cst_32 = arith.constant 1.000000e+00 : f32
    %106 = vector.broadcast %cst_32 : f32 to vector<1x128xf32>
    %107 = arith.addf %106, %105 : vector<1x128xf32>
    %108 = arith.divf %106, %107 : vector<1x128xf32>
    %109 = arith.mulf %91, %77 : vector<1x128xf32>
    %cst_33 = arith.constant 1.000000e+00 : f32
    %110 = vector.broadcast %cst_33 : f32 to vector<1x128xf32>
    %111 = arith.subf %110, %91 : vector<1x128xf32>
    %112 = arith.mulf %111, %108 : vector<1x128xf32>
    %113 = arith.addf %109, %112 : vector<1x128xf32>
    %114 = arith.index_cast %c2_i32 : i32 to index
    %c0_34 = arith.constant 0 : index
    %115 = vector.load %arg4[%114, %c0_34] : memref<8x128xf32, #tpu.memory_space<vmem>>, vector<1x128xf32>
    tpu.vector_store %arg4[%114, %c0_34], %113 {strides = array<i32>} : memref<8x128xf32, #tpu.memory_space<vmem>>, vector<1x128xf32>,
    %c3_i32 = arith.constant 3 : i32
    %116 = arith.index_cast %c3_i32 : i32 to index
    %c0_35 = arith.constant 0 : index
    %117 = vector.load %arg5[%116, %c0_35] : memref<8x384xf32, #tpu.memory_space<vmem>>, vector<1x384xf32>
    %c0_36 = arith.constant 0 : index
    %c0_37 = arith.constant 0 : index
    %118 = vector.load %arg2[%c0_36, %c0_37] : memref<128x384xf32, #tpu.memory_space<vmem>>, vector<128x384xf32>
    %cst_38 = arith.constant dense<0.000000e+00> : vector<1x384xf32>
    %119 = tpu.matmul %113, %118, %cst_38 {dimension_numbers = #tpu.dot_dimension_numbers<[1], [0], [0], [1], [0, 0, 1, 1], [], []>} : vector<1x128xf32>, vector<128x384xf32>, vector<1x384xf32> -> vector<1x384xf32>
    %120 = vector.extract_strided_slice %117 {offsets = [0, 0], sizes = [1, 128], strides = [1, 1]} : vector<1x384xf32> to vector<1x128xf32>
    %121 = vector.extract_strided_slice %119 {offsets = [0, 0], sizes = [1, 128], strides = [1, 1]} : vector<1x384xf32> to vector<1x128xf32>
    %122 = arith.addf %120, %121 : vector<1x128xf32>
    %123 = arith.negf %122 : vector<1x128xf32>
    %124 = math.exp %123 : vector<1x128xf32>
    %cst_39 = arith.constant 1.000000e+00 : f32
    %125 = vector.broadcast %cst_39 : f32 to vector<1x128xf32>
    %126 = arith.addf %125, %124 : vector<1x128xf32>
    %127 = arith.divf %125, %126 : vector<1x128xf32>
    %128 = vector.extract_strided_slice %117 {offsets = [0, 128], sizes = [1, 128], strides = [1, 1]} : vector<1x384xf32> to vector<1x128xf32>
    %129 = vector.extract_strided_slice %119 {offsets = [0, 128], sizes = [1, 128], strides = [1, 1]} : vector<1x384xf32> to vector<1x128xf32>
    %130 = arith.addf %128, %129 : vector<1x128xf32>
    %131 = arith.negf %130 : vector<1x128xf32>
    %132 = math.exp %131 : vector<1x128xf32>
    %cst_40 = arith.constant 1.000000e+00 : f32
    %133 = vector.broadcast %cst_40 : f32 to vector<1x128xf32>
    %134 = arith.addf %133, %132 : vector<1x128xf32>
    %135 = arith.divf %133, %134 : vector<1x128xf32>
    %136 = vector.extract_strided_slice %117 {offsets = [0, 256], sizes = [1, 128], strides = [1, 1]} : vector<1x384xf32> to vector<1x128xf32>
    %137 = vector.extract_strided_slice %119 {offsets = [0, 256], sizes = [1, 128], strides = [1, 1]} : vector<1x384xf32> to vector<1x128xf32>
    %138 = arith.mulf %135, %137 : vector<1x128xf32>
    %139 = arith.addf %136, %138 : vector<1x128xf32>
    %140 = arith.negf %139 : vector<1x128xf32>
    %141 = math.exp %140 : vector<1x128xf32>
    %cst_41 = arith.constant 1.000000e+00 : f32
    %142 = vector.broadcast %cst_41 : f32 to vector<1x128xf32>
    %143 = arith.addf %142, %141 : vector<1x128xf32>
    %144 = arith.divf %142, %143 : vector<1x128xf32>
    %145 = arith.mulf %127, %113 : vector<1x128xf32>
    %cst_42 = arith.constant 1.000000e+00 : f32
    %146 = vector.broadcast %cst_42 : f32 to vector<1x128xf32>
    %147 = arith.subf %146, %127 : vector<1x128xf32>
    %148 = arith.mulf %147, %144 : vector<1x128xf32>
    %149 = arith.addf %145, %148 : vector<1x128xf32>
    %150 = arith.index_cast %c3_i32 : i32 to index
    %c0_43 = arith.constant 0 : index
    %151 = vector.load %arg4[%150, %c0_43] : memref<8x128xf32, #tpu.memory_space<vmem>>, vector<1x128xf32>
    tpu.vector_store %arg4[%150, %c0_43], %149 {strides = array<i32>} : memref<8x128xf32, #tpu.memory_space<vmem>>, vector<1x128xf32>,
    %c4_i32 = arith.constant 4 : i32
    %152 = arith.index_cast %c4_i32 : i32 to index
    %c0_44 = arith.constant 0 : index
    %153 = vector.load %arg5[%152, %c0_44] : memref<8x384xf32, #tpu.memory_space<vmem>>, vector<1x384xf32>
    %c0_45 = arith.constant 0 : index
    %c0_46 = arith.constant 0 : index
    %154 = vector.load %arg2[%c0_45, %c0_46] : memref<128x384xf32, #tpu.memory_space<vmem>>, vector<128x384xf32>
    %cst_47 = arith.constant dense<0.000000e+00> : vector<1x384xf32>
    %155 = tpu.matmul %149, %154, %cst_47 {dimension_numbers = #tpu.dot_dimension_numbers<[1], [0], [0], [1], [0, 0, 1, 1], [], []>} : vector<1x128xf32>, vector<128x384xf32>, vector<1x384xf32> -> vector<1x384xf32>
    %156 = vector.extract_strided_slice %153 {offsets = [0, 0], sizes = [1, 128], strides = [1, 1]} : vector<1x384xf32> to vector<1x128xf32>
    %157 = vector.extract_strided_slice %155 {offsets = [0, 0], sizes = [1, 128], strides = [1, 1]} : vector<1x384xf32> to vector<1x128xf32>
    %158 = arith.addf %156, %157 : vector<1x128xf32>
    %159 = arith.negf %158 : vector<1x128xf32>
    %160 = math.exp %159 : vector<1x128xf32>
    %cst_48 = arith.constant 1.000000e+00 : f32
    %161 = vector.broadcast %cst_48 : f32 to vector<1x128xf32>
    %162 = arith.addf %161, %160 : vector<1x128xf32>
    %163 = arith.divf %161, %162 : vector<1x128xf32>
    %164 = vector.extract_strided_slice %153 {offsets = [0, 128], sizes = [1, 128], strides = [1, 1]} : vector<1x384xf32> to vector<1x128xf32>
    %165 = vector.extract_strided_slice %155 {offsets = [0, 128], sizes = [1, 128], strides = [1, 1]} : vector<1x384xf32> to vector<1x128xf32>
    %166 = arith.addf %164, %165 : vector<1x128xf32>
    %167 = arith.negf %166 : vector<1x128xf32>
    %168 = math.exp %167 : vector<1x128xf32>
    %cst_49 = arith.constant 1.000000e+00 : f32
    %169 = vector.broadcast %cst_49 : f32 to vector<1x128xf32>
    %170 = arith.addf %169, %168 : vector<1x128xf32>
    %171 = arith.divf %169, %170 : vector<1x128xf32>
    %172 = vector.extract_strided_slice %153 {offsets = [0, 256], sizes = [1, 128], strides = [1, 1]} : vector<1x384xf32> to vector<1x128xf32>
    %173 = vector.extract_strided_slice %155 {offsets = [0, 256], sizes = [1, 128], strides = [1, 1]} : vector<1x384xf32> to vector<1x128xf32>
    %174 = arith.mulf %171, %173 : vector<1x128xf32>
    %175 = arith.addf %172, %174 : vector<1x128xf32>
    %176 = arith.negf %175 : vector<1x128xf32>
    %177 = math.exp %176 : vector<1x128xf32>
    %cst_50 = arith.constant 1.000000e+00 : f32
    %178 = vector.broadcast %cst_50 : f32 to vector<1x128xf32>
    %179 = arith.addf %178, %177 : vector<1x128xf32>
    %180 = arith.divf %178, %179 : vector<1x128xf32>
    %181 = arith.mulf %163, %149 : vector<1x128xf32>
    %cst_51 = arith.constant 1.000000e+00 : f32
    %182 = vector.broadcast %cst_51 : f32 to vector<1x128xf32>
    %183 = arith.subf %182, %163 : vector<1x128xf32>
    %184 = arith.mulf %183, %180 : vector<1x128xf32>
    %185 = arith.addf %181, %184 : vector<1x128xf32>
    %186 = arith.index_cast %c4_i32 : i32 to index
    %c0_52 = arith.constant 0 : index
    %187 = vector.load %arg4[%186, %c0_52] : memref<8x128xf32, #tpu.memory_space<vmem>>, vector<1x128xf32>
    tpu.vector_store %arg4[%186, %c0_52], %185 {strides = array<i32>} : memref<8x128xf32, #tpu.memory_space<vmem>>, vector<1x128xf32>,
    %c5_i32 = arith.constant 5 : i32
    %188 = arith.index_cast %c5_i32 : i32 to index
    %c0_53 = arith.constant 0 : index
    %189 = vector.load %arg5[%188, %c0_53] : memref<8x384xf32, #tpu.memory_space<vmem>>, vector<1x384xf32>
    %c0_54 = arith.constant 0 : index
    %c0_55 = arith.constant 0 : index
    %190 = vector.load %arg2[%c0_54, %c0_55] : memref<128x384xf32, #tpu.memory_space<vmem>>, vector<128x384xf32>
    %cst_56 = arith.constant dense<0.000000e+00> : vector<1x384xf32>
    %191 = tpu.matmul %185, %190, %cst_56 {dimension_numbers = #tpu.dot_dimension_numbers<[1], [0], [0], [1], [0, 0, 1, 1], [], []>} : vector<1x128xf32>, vector<128x384xf32>, vector<1x384xf32> -> vector<1x384xf32>
    %192 = vector.extract_strided_slice %189 {offsets = [0, 0], sizes = [1, 128], strides = [1, 1]} : vector<1x384xf32> to vector<1x128xf32>
    %193 = vector.extract_strided_slice %191 {offsets = [0, 0], sizes = [1, 128], strides = [1, 1]} : vector<1x384xf32> to vector<1x128xf32>
    %194 = arith.addf %192, %193 : vector<1x128xf32>
    %195 = arith.negf %194 : vector<1x128xf32>
    %196 = math.exp %195 : vector<1x128xf32>
    %cst_57 = arith.constant 1.000000e+00 : f32
    %197 = vector.broadcast %cst_57 : f32 to vector<1x128xf32>
    %198 = arith.addf %197, %196 : vector<1x128xf32>
    %199 = arith.divf %197, %198 : vector<1x128xf32>
    %200 = vector.extract_strided_slice %189 {offsets = [0, 128], sizes = [1, 128], strides = [1, 1]} : vector<1x384xf32> to vector<1x128xf32>
    %201 = vector.extract_strided_slice %191 {offsets = [0, 128], sizes = [1, 128], strides = [1, 1]} : vector<1x384xf32> to vector<1x128xf32>
    %202 = arith.addf %200, %201 : vector<1x128xf32>
    %203 = arith.negf %202 : vector<1x128xf32>
    %204 = math.exp %203 : vector<1x128xf32>
    %cst_58 = arith.constant 1.000000e+00 : f32
    %205 = vector.broadcast %cst_58 : f32 to vector<1x128xf32>
    %206 = arith.addf %205, %204 : vector<1x128xf32>
    %207 = arith.divf %205, %206 : vector<1x128xf32>
    %208 = vector.extract_strided_slice %189 {offsets = [0, 256], sizes = [1, 128], strides = [1, 1]} : vector<1x384xf32> to vector<1x128xf32>
    %209 = vector.extract_strided_slice %191 {offsets = [0, 256], sizes = [1, 128], strides = [1, 1]} : vector<1x384xf32> to vector<1x128xf32>
    %210 = arith.mulf %207, %209 : vector<1x128xf32>
    %211 = arith.addf %208, %210 : vector<1x128xf32>
    %212 = arith.negf %211 : vector<1x128xf32>
    %213 = math.exp %212 : vector<1x128xf32>
    %cst_59 = arith.constant 1.000000e+00 : f32
    %214 = vector.broadcast %cst_59 : f32 to vector<1x128xf32>
    %215 = arith.addf %214, %213 : vector<1x128xf32>
    %216 = arith.divf %214, %215 : vector<1x128xf32>
    %217 = arith.mulf %199, %185 : vector<1x128xf32>
    %cst_60 = arith.constant 1.000000e+00 : f32
    %218 = vector.broadcast %cst_60 : f32 to vector<1x128xf32>
    %219 = arith.subf %218, %199 : vector<1x128xf32>
    %220 = arith.mulf %219, %216 : vector<1x128xf32>
    %221 = arith.addf %217, %220 : vector<1x128xf32>
    %222 = arith.index_cast %c5_i32 : i32 to index
    %c0_61 = arith.constant 0 : index
    %223 = vector.load %arg4[%222, %c0_61] : memref<8x128xf32, #tpu.memory_space<vmem>>, vector<1x128xf32>
    tpu.vector_store %arg4[%222, %c0_61], %221 {strides = array<i32>} : memref<8x128xf32, #tpu.memory_space<vmem>>, vector<1x128xf32>,
    %c6_i32 = arith.constant 6 : i32
    %224 = arith.index_cast %c6_i32 : i32 to index
    %c0_62 = arith.constant 0 : index
    %225 = vector.load %arg5[%224, %c0_62] : memref<8x384xf32, #tpu.memory_space<vmem>>, vector<1x384xf32>
    %c0_63 = arith.constant 0 : index
    %c0_64 = arith.constant 0 : index
    %226 = vector.load %arg2[%c0_63, %c0_64] : memref<128x384xf32, #tpu.memory_space<vmem>>, vector<128x384xf32>
    %cst_65 = arith.constant dense<0.000000e+00> : vector<1x384xf32>
    %227 = tpu.matmul %221, %226, %cst_65 {dimension_numbers = #tpu.dot_dimension_numbers<[1], [0], [0], [1], [0, 0, 1, 1], [], []>} : vector<1x128xf32>, vector<128x384xf32>, vector<1x384xf32> -> vector<1x384xf32>
    %228 = vector.extract_strided_slice %225 {offsets = [0, 0], sizes = [1, 128], strides = [1, 1]} : vector<1x384xf32> to vector<1x128xf32>
    %229 = vector.extract_strided_slice %227 {offsets = [0, 0], sizes = [1, 128], strides = [1, 1]} : vector<1x384xf32> to vector<1x128xf32>
    %230 = arith.addf %228, %229 : vector<1x128xf32>
    %231 = arith.negf %230 : vector<1x128xf32>
    %232 = math.exp %231 : vector<1x128xf32>
    %cst_66 = arith.constant 1.000000e+00 : f32
    %233 = vector.broadcast %cst_66 : f32 to vector<1x128xf32>
    %234 = arith.addf %233, %232 : vector<1x128xf32>
    %235 = arith.divf %233, %234 : vector<1x128xf32>
    %236 = vector.extract_strided_slice %225 {offsets = [0, 128], sizes = [1, 128], strides = [1, 1]} : vector<1x384xf32> to vector<1x128xf32>
    %237 = vector.extract_strided_slice %227 {offsets = [0, 128], sizes = [1, 128], strides = [1, 1]} : vector<1x384xf32> to vector<1x128xf32>
    %238 = arith.addf %236, %237 : vector<1x128xf32>
    %239 = arith.negf %238 : vector<1x128xf32>
    %240 = math.exp %239 : vector<1x128xf32>
    %cst_67 = arith.constant 1.000000e+00 : f32
    %241 = vector.broadcast %cst_67 : f32 to vector<1x128xf32>
    %242 = arith.addf %241, %240 : vector<1x128xf32>
    %243 = arith.divf %241, %242 : vector<1x128xf32>
    %244 = vector.extract_strided_slice %225 {offsets = [0, 256], sizes = [1, 128], strides = [1, 1]} : vector<1x384xf32> to vector<1x128xf32>
    %245 = vector.extract_strided_slice %227 {offsets = [0, 256], sizes = [1, 128], strides = [1, 1]} : vector<1x384xf32> to vector<1x128xf32>
    %246 = arith.mulf %243, %245 : vector<1x128xf32>
    %247 = arith.addf %244, %246 : vector<1x128xf32>
    %248 = arith.negf %247 : vector<1x128xf32>
    %249 = math.exp %248 : vector<1x128xf32>
    %cst_68 = arith.constant 1.000000e+00 : f32
    %250 = vector.broadcast %cst_68 : f32 to vector<1x128xf32>
    %251 = arith.addf %250, %249 : vector<1x128xf32>
    %252 = arith.divf %250, %251 : vector<1x128xf32>
    %253 = arith.mulf %235, %221 : vector<1x128xf32>
    %cst_69 = arith.constant 1.000000e+00 : f32
    %254 = vector.broadcast %cst_69 : f32 to vector<1x128xf32>
    %255 = arith.subf %254, %235 : vector<1x128xf32>
    %256 = arith.mulf %255, %252 : vector<1x128xf32>
    %257 = arith.addf %253, %256 : vector<1x128xf32>
    %258 = arith.index_cast %c6_i32 : i32 to index
    %c0_70 = arith.constant 0 : index
    %259 = vector.load %arg4[%258, %c0_70] : memref<8x128xf32, #tpu.memory_space<vmem>>, vector<1x128xf32>
    tpu.vector_store %arg4[%258, %c0_70], %257 {strides = array<i32>} : memref<8x128xf32, #tpu.memory_space<vmem>>, vector<1x128xf32>,
    %c7_i32 = arith.constant 7 : i32
    %260 = arith.index_cast %c7_i32 : i32 to index
    %c0_71 = arith.constant 0 : index
    %261 = vector.load %arg5[%260, %c0_71] : memref<8x384xf32, #tpu.memory_space<vmem>>, vector<1x384xf32>
    %c0_72 = arith.constant 0 : index
    %c0_73 = arith.constant 0 : index
    %262 = vector.load %arg2[%c0_72, %c0_73] : memref<128x384xf32, #tpu.memory_space<vmem>>, vector<128x384xf32>
    %cst_74 = arith.constant dense<0.000000e+00> : vector<1x384xf32>
    %263 = tpu.matmul %257, %262, %cst_74 {dimension_numbers = #tpu.dot_dimension_numbers<[1], [0], [0], [1], [0, 0, 1, 1], [], []>} : vector<1x128xf32>, vector<128x384xf32>, vector<1x384xf32> -> vector<1x384xf32>
    %264 = vector.extract_strided_slice %261 {offsets = [0, 0], sizes = [1, 128], strides = [1, 1]} : vector<1x384xf32> to vector<1x128xf32>
    %265 = vector.extract_strided_slice %263 {offsets = [0, 0], sizes = [1, 128], strides = [1, 1]} : vector<1x384xf32> to vector<1x128xf32>
    %266 = arith.addf %264, %265 : vector<1x128xf32>
    %267 = arith.negf %266 : vector<1x128xf32>
    %268 = math.exp %267 : vector<1x128xf32>
    %cst_75 = arith.constant 1.000000e+00 : f32
    %269 = vector.broadcast %cst_75 : f32 to vector<1x128xf32>
    %270 = arith.addf %269, %268 : vector<1x128xf32>
    %271 = arith.divf %269, %270 : vector<1x128xf32>
    %272 = vector.extract_strided_slice %261 {offsets = [0, 128], sizes = [1, 128], strides = [1, 1]} : vector<1x384xf32> to vector<1x128xf32>
    %273 = vector.extract_strided_slice %263 {offsets = [0, 128], sizes = [1, 128], strides = [1, 1]} : vector<1x384xf32> to vector<1x128xf32>
    %274 = arith.addf %272, %273 : vector<1x128xf32>
    %275 = arith.negf %274 : vector<1x128xf32>
    %276 = math.exp %275 : vector<1x128xf32>
    %cst_76 = arith.constant 1.000000e+00 : f32
    %277 = vector.broadcast %cst_76 : f32 to vector<1x128xf32>
    %278 = arith.addf %277, %276 : vector<1x128xf32>
    %279 = arith.divf %277, %278 : vector<1x128xf32>
    %280 = vector.extract_strided_slice %261 {offsets = [0, 256], sizes = [1, 128], strides = [1, 1]} : vector<1x384xf32> to vector<1x128xf32>
    %281 = vector.extract_strided_slice %263 {offsets = [0, 256], sizes = [1, 128], strides = [1, 1]} : vector<1x384xf32> to vector<1x128xf32>
    %282 = arith.mulf %279, %281 : vector<1x128xf32>
    %283 = arith.addf %280, %282 : vector<1x128xf32>
    %284 = arith.negf %283 : vector<1x128xf32>
    %285 = math.exp %284 : vector<1x128xf32>
    %cst_77 = arith.constant 1.000000e+00 : f32
    %286 = vector.broadcast %cst_77 : f32 to vector<1x128xf32>
    %287 = arith.addf %286, %285 : vector<1x128xf32>
    %288 = arith.divf %286, %287 : vector<1x128xf32>
    %289 = arith.mulf %271, %257 : vector<1x128xf32>
    %cst_78 = arith.constant 1.000000e+00 : f32
    %290 = vector.broadcast %cst_78 : f32 to vector<1x128xf32>
    %291 = arith.subf %290, %271 : vector<1x128xf32>
    %292 = arith.mulf %291, %288 : vector<1x128xf32>
    %293 = arith.addf %289, %292 : vector<1x128xf32>
    %294 = arith.index_cast %c7_i32 : i32 to index
    %c0_79 = arith.constant 0 : index
    %295 = vector.load %arg4[%294, %c0_79] : memref<8x128xf32, #tpu.memory_space<vmem>>, vector<1x128xf32>
    tpu.vector_store %arg4[%294, %c0_79], %293 {strides = array<i32>} : memref<8x128xf32, #tpu.memory_space<vmem>>, vector<1x128xf32>,
    %c8_i32 = arith.constant 8 : i32
    return
  }
}

</mosaic_0001>

<bundles_post_ra>
// kernel: gru_forward.1
= control target key start
LH: loop header
LB: loop body
LE: loop exit
PB: predicated region body
PF: predicated region fallthrough
CT: control target
= control target key end

     0   :  { %9 = vsyncpa [#allocation4], 0  ;;  %s3618_s0 = inlined_call_operand.hbm [shape: f32[8,16], index: 0, kind: input, shape index: {}]   ;;  %s3619_s1 = inlined_call_operand.hbm [shape: f32[16,384], index: 1, kind: input, shape index: {}]   ;;  %s3620_s2 = inlined_call_operand.hbm [shape: f32[128,384], index: 2, kind: input, shape index: {}]   ;;  %s3621_s3 = inlined_call_operand.vmem [shape: f32[1,384], index: 3, kind: input, shape index: {}]   ;;  %s3622_s4 = inlined_call_operand.vmem [shape: f32[8,128], index: 4, kind: output, shape index: {}]  }
   0x1   :  { %10 = vsyncpa [#allocation6], 0  ;;  %s3098_s15 = smov [#allocation5]   ;;  %s3028_s19 = scalar_lea.hbm %s3619_s1, 768 }
   0x2   :  { %s26_s16 = sshll.u32 %s3098_s15, 4  ;;  %p3029_p0 = scmp.ne.s32.totalorder %s3619_s1, %s3028_s19  ;;  %s27_s16 = int_to_ptr.vmem [resolvable:$true] %s26_s16 }
   0x3   :  { %p3032_p1 = scmp.lt.u32.totalorder %s3028_s19, %s3619_s1 }
   0x5   :  { %p3034_p2 = pnand %p3032_p1, %p3029_p0 }
   0x7   :  { %3037 = shalt.err (!%p3034_p2)
}
   0x8   :  { %s3038_s24 = scalar_lea.vmem %s27_s16, 768  ;;  %p3043_p4 = scmp.lt.s32.totalorder %s27_s16, %s27_s16 }
   0x9   :  { %p3039_p3 = scmp.ne.s32.totalorder %s27_s16, %s3038_s24  ;;  %p3044_p5 = scmp.lt.s32.totalorder %s3038_s24, %s3038_s24 }
   0xb   :  { %p3045_p6 = por %p3044_p5, %p3043_p4 }
   0xd   :  { %p3046_p7 = pnand %p3045_p6, %p3039_p3 }
   0xf   :  { %3049 = shalt.err (!%p3046_p7)
}
  0x10   :  { %s3099_s25 = smov 384   ;;  %s3100_s26 = smov 24  }
  0x11   :  { %32 = dma.hbm_to_vmem [thread:$0]  %s3619_s1, 768, %s27_s16, [#allocation6], %s3099_s25, %s3099_s25, %s3100_s26  }
  0x12   :  { %s3101_s29 = smov [#allocation3]   ;;  %s3102_s5 = smov [#allocation7]  }
  0x13   :  { %s17_s30 = sshll.u32 %s3101_s29, 4  ;;  %s38_s6 = sshll.u32 %s3102_s5, 4  ;;  %s18_s30 = int_to_ptr.vmem [resolvable:$true] %s17_s30  ;;  %s39_s6 = int_to_ptr.vmem [resolvable:$true] %s38_s6 }
  0x14   :  { %s3050_s9 = scalar_lea.hbm %s3618_s0, 128 }
  0x15   :  { %p3051_p8 = scmp.ne.s32.totalorder %s3618_s0, %s3050_s9  ;;  %p3054_p9 = scmp.lt.u32.totalorder %s3050_s9, %s3618_s0 }
  0x17   :  { %p3056_p10 = pnand %p3054_p9, %p3051_p8 }
  0x19   :  { %3059 = shalt.err (!%p3056_p10)
}
  0x1a   :  { %s3060_s1 = scalar_lea.vmem %s18_s30, 128  ;;  %p3065_p12 = scmp.lt.s32.totalorder %s18_s30, %s18_s30 }
  0x1b   :  { %p3061_p11 = scmp.ne.s32.totalorder %s18_s30, %s3060_s1  ;;  %p3066_p13 = scmp.lt.s32.totalorder %s3060_s1, %s3060_s1 }
  0x1d   :  { %p3067_p0 = por %p3066_p13, %p3065_p12 }
  0x1f   :  { %p3068_p1 = pnand %p3067_p0, %p3061_p11 }
  0x21   :  { %3071 = shalt.err (!%p3068_p1)
}
  0x22   :  { %20 = dma.hbm_to_vmem [thread:$0]  %s3618_s0, 128, %s18_s30, [#allocation4]  }
  0x23   :  { %s3072_s18 = scalar_lea.hbm %s3620_s2, 6144 }
  0x24   :  { %p3073_p2 = scmp.ne.s32.totalorder %s3620_s2, %s3072_s18  ;;  %p3076_p3 = scmp.lt.u32.totalorder %s3072_s18, %s3620_s2 }
  0x26   :  { %p3078_p4 = pnand %p3076_p3, %p3073_p2 }
  0x28   :  { %3081 = shalt.err (!%p3078_p4)
}
  0x29   :  { %s3082_s23 = scalar_lea.vmem %s39_s6, 6144  ;;  %p3087_p6 = scmp.lt.s32.totalorder %s39_s6, %s39_s6 }
  0x2a   :  { %p3083_p5 = scmp.ne.s32.totalorder %s39_s6, %s3082_s23  ;;  %p3088_p7 = scmp.lt.s32.totalorder %s3082_s23, %s3082_s23 }
  0x2c   :  { %p3089_p8 = por %p3088_p7, %p3087_p6 }
  0x2e   :  { %p3090_p9 = pnand %p3089_p8, %p3083_p5 }
  0x30   :  { %3093 = shalt.err (!%p3090_p9)
}
  0x31   :  { %44 = dma.hbm_to_vmem [thread:$0]  %s3620_s2, 6144, %s39_s6, [#allocation6], %s3099_s25, %s3099_s25, %s3100_s26  }
  0x32   :  { %3094 = dma.done.wait [#allocation4], 128  }
  0x33   :  { %3095 = vsyncadd [#allocation4], 4294967168 }
  0x34   :  { %3096 = dma.done.wait [#allocation6], 6912  }
  0x35   :  { %3097 = vsyncadd [#allocation6], 4294960384  ;;  %v3103_v0 = vmov 0.0|0.0   ;;  %v3104_v1 = vmov 0.0   ;;  %vm3105_vm0 = vmmov 0   ;;  %v58_v2 = vld [vmem:[#allocation5 + $0x8] sm:$0xff] }
  0x36   :  { %2473 = vmatprep.subr.bf16.mxu1 %v3103_v0  ;;  %148 = vmatprep.mubr.f32.mxu0 %v3104_v1  ;;  %v61_v3 = vld [vmem:[#allocation5 + $0x20] sm:$0xff]  ;;  %v60_v6 = vld [vmem:[#allocation5 + $0x18] sm:$0xff]  ;;  %v59_v7 = vld [vmem:[#allocation5 + $0x10] sm:$0xff]  ;;  %vm80_vm1 = vcmask 130048  }
  0x37   :  { %2186 = vmatprep.mubr.msk.f32.mxu1 %vm3105_vm0, %v3104_v1  ;;  %v57_v4 = vld [vmem:[#allocation5] sm:$0xff]  ;;  %v2469_v5 = vpack.c.bf16 %v61_v3, %v58_v2  ;;  %v62_v8 = vld [vmem:[#allocation5 + $0x28] sm:$0xff]  ;;  %v230_v11 = vld [vmem:[#allocation7 + $0x8] sm:$0xff] }
  0x38   :  { %v2471_v9 = vpack.c.bf16 %v60_v6, %v57_v4  ;;  %v2474_v10 = vpack.c.bf16 %v62_v8, %v59_v7  ;;  %v233_v12 = vld [vmem:[#allocation7 + $0x20] sm:$0xff]  ;;  %v232_v15 = vld [vmem:[#allocation7 + $0x18] sm:$0xff]  ;;  %v56_v17 = vld [vmem:[#allocation3] sm:$0xff] }
  0x39   :  { %2470 = vmatprep.subr.bf16.mxu0 %v2469_v5  ;;  %v3177_v13 = vpack.c.bf16 %v233_v12, %v230_v11  ;;  %v229_v14 = vld [vmem:[#allocation7] sm:$0xff]  ;;  %v236_v16 = vld [vmem:[#allocation7 + $0x38] sm:$0xff]  ;;  %v239_v19 = vld [vmem:[#allocation7 + $0x50] sm:$0xff] }
  0x3a   :  { %2472 = vmatpush1.bf16.msra.mxu0 %v2471_v9  ;;  %2475 = vmatpush3.bf16.msra.mxu1 %v2474_v10  ;;  %v3179_v18 = vpack.c.bf16 %v232_v15, %v229_v14  ;;  %v3182_v20 = vpack.c.bf16 %v239_v19, %v236_v16  ;;  %v235_v21 = vld [vmem:[#allocation7 + $0x30] sm:$0xff]  ;;  %v238_v22 = vld [vmem:[#allocation7 + $0x48] sm:$0xff]  ;;  %v245_v24 = vld [vmem:[#allocation7 + $0x80] sm:$0xff] }
  0x3b   :  { %2477 = vmatprep.subr.bf16.mxu0 %v3177_v13  ;;  %2508 = vmatprep.subr.bf16.mxu1 %v3103_v0  ;;  %v242_v23 = vld [vmem:[#allocation7 + $0x68] sm:$0xff]  ;;  %v3186_v25 = vpack.c.bf16 %v238_v22, %v235_v21  ;;  %v241_v27 = vld [vmem:[#allocation7 + $0x60] sm:$0xff]  ;;  %v244_v28 = vld [vmem:[#allocation7 + $0x78] sm:$0xff] }
  0x3c   :  { %v3190_v26 = vpack.c.bf16 %v245_v24, %v242_v23  ;;  %v248_v29 = vld [vmem:[#allocation7 + $0x98] sm:$0xff]  ;;  %v251_v30 = vld [vmem:[#allocation7 + $0xb0] sm:$0xff]  ;;  %v3195_v31 = vpack.c.bf16 %v244_v28, %v241_v27  ;;  %v250_v33 = vld [vmem:[#allocation7 + $0xa8] sm:$0xff]  ;;  %v65_v27 = vlaneseq }
  0x3d   :  { %2017 = vmatmul.mubr.msk.f32.vlgmr.msra.gmra.mrb[0].mxu0 %vm80_vm1, %v56_v17  ;;  %2187 = vmatmul.mubr.msk.f32.vlgmr.msra.gmra.mrb[0].mxu1 %vm80_vm1, %v56_v17  ;;  %v247_v32 = vld [vmem:[#allocation7 + $0x90] sm:$0xff]  ;;  %v3198_v34 = vpack.c.bf16 %v251_v30, %v248_v29  ;;  %v234_v36 = vld [vmem:[#allocation7 + $0x28] sm:$0xff]  ;;  %v237_v37 = vld [vmem:[#allocation7 + $0x40] sm:$0xff] }
  0x3e   :  { %2479 = vmatpush1.bf16.msra.mxu0 %v3179_v18  ;;  %341 = vmatprep.mubr.f32.mxu0 %v3104_v1  ;;  %v231_v35 = vld [vmem:[#allocation7 + $0x10] sm:$0xff]  ;;  %v254_v38 = vld [vmem:[#allocation7 + $0xc8] sm:$0xff]  ;;  %v257_v39 = vld [vmem:[#allocation7 + $0xe0] sm:$0xff]  ;;  %v3203_v42 = vpack.c.bf16 %v250_v33, %v247_v32  ;;  %v66_v28 = vshrl.u32 %v65_v27, 7 }
  0x3f   :  { %2481 = vmatprep.subr.bf16.mxu0 %v3182_v20  ;;  %2221 = vmatprep.mubr.msk.f32.mxu1 %vm3105_vm0, %v3104_v1  ;;  %v3200_v40 = vpack.c.bf16 %v234_v36, %v231_v35  ;;  %v240_v41 = vld [vmem:[#allocation7 + $0x58] sm:$0xff]  ;;  %v253_v43 = vld [vmem:[#allocation7 + $0xc0] sm:$0xff]  ;;  %v3209_v45 = vpack.c.bf16 %v257_v39, %v254_v38  ;;  %v243_v47 = vld [vmem:[#allocation7 + $0x70] sm:$0xff] }
  0x40   :  { %v3206_v44 = vpack.c.bf16 %v240_v41, %v237_v37  ;;  %v256_v46 = vld [vmem:[#allocation7 + $0xd8] sm:$0xff]  ;;  %v246_v48 = vld [vmem:[#allocation7 + $0x88] sm:$0xff]  ;;  %v263_v50 = vld [vmem:[#allocation7 + $0x110] sm:$0xff]  ;;  %v67_v29 = vsub.s32 0, %v66_v28  ;;  %v75_v30 = vsub.s32 2, %v66_v28  ;;  %v71_v33 = vsub.s32 1, %v66_v28 }
  0x41   :  { %2510 = vmatpush3.bf16.msra.mxu1 %v3200_v40  ;;  %v260_v49 = vld [vmem:[#allocation7 + $0xf8] sm:$0xff]  ;;  %v3213_v51 = vpack.c.bf16 %v256_v46, %v253_v43  ;;  %v259_v52 = vld [vmem:[#allocation7 + $0xf0] sm:$0xff]  ;;  %v3216_v53 = vpack.c.bf16 %v246_v48, %v243_v47  ;;  %v262_v55 = vld [vmem:[#allocation7 + $0x108] sm:$0xff] }
  0x42   :  { %2483 = vmatpush1.bf16.msra.mxu0 %v3186_v25  ;;  %2511 = vmatprep.subr.bf16.mxu1 %v3103_v0  ;;  %v3219_v54 = vpack.c.bf16 %v263_v50, %v260_v49  ;;  %v249_v56 = vld [vmem:[#allocation7 + $0xa0] sm:$0xff]  ;;  %v252_v57 = vld [vmem:[#allocation7 + $0xb8] sm:$0xff]  ;;  %v266_v58 = vld [vmem:[#allocation7 + $0x128] sm:$0xff]  ;;  %v3223_v60 = vpack.c.bf16 %v262_v55, %v259_v52 }
  0x43   :  { %2485 = vmatprep.subr.bf16.mxu0 %v3190_v26  ;;  %v269_v59 = vld [vmem:[#allocation7 + $0x140] sm:$0xff]  ;;  %v3226_v62 = vpack.c.bf16 %v252_v57, %v249_v56  ;;  %v268_v2 = vld [vmem:[#allocation7 + $0x138] sm:$0xff]  ;;  %v255_v3 = vld [vmem:[#allocation7 + $0xd0] sm:$0xff] }
  0x44   :  { %v265_v61 = vld [vmem:[#allocation7 + $0x120] sm:$0xff]  ;;  %v3229_v63 = vpack.c.bf16 %v269_v59, %v266_v58  ;;  %v258_v4 = vld [vmem:[#allocation7 + $0xe8] sm:$0xff]  ;;  %v272_v5 = vld [vmem:[#allocation7 + $0x158] sm:$0xff] }
  0x45   :  { %2513 = vmatpush3.bf16.msra.mxu1 %v3206_v44  ;;  %v275_v6 = vld [vmem:[#allocation7 + $0x170] sm:$0xff]  ;;  %v3233_v7 = vpack.c.bf16 %v268_v2, %v265_v61  ;;  %v3236_v9 = vpack.c.bf16 %v258_v4, %v255_v3  ;;  %v274_v11 = vld [vmem:[#allocation7 + $0x168] sm:$0xff]  ;;  %v261_v12 = vld [vmem:[#allocation7 + $0x100] sm:$0xff] }
  0x46   :  { %2487 = vmatpush1.bf16.msra.mxu0 %v3195_v31  ;;  %2514 = vmatprep.subr.bf16.mxu1 %v3103_v0  ;;  %v271_v8 = vld [vmem:[#allocation7 + $0x150] sm:$0xff]  ;;  %v3239_v10 = vpack.c.bf16 %v275_v6, %v272_v5  ;;  %v264_v14 = vld [vmem:[#allocation7 + $0x118] sm:$0xff]  ;;  %v270_v19 = vld [vmem:[#allocation7 + $0x148] sm:$0xff] }
  0x47   :  { %2489 = vmatprep.subr.bf16.mxu0 %v3198_v34  ;;  %v3243_v15 = vpack.c.bf16 %v274_v11, %v271_v8  ;;  %v3246_v16 = vpack.c.bf16 %v264_v14, %v261_v12  ;;  %v267_v17 = vld [vmem:[#allocation7 + $0x130] sm:$0xff]  ;;  %v273_v22 = vld [vmem:[#allocation7 + $0x160] sm:$0xff]  ;;  %v276_v23 = vld [vmem:[#allocation7 + $0x178] sm:$0xff] }
  0x48   :  { %v3252_v21 = vpack.c.bf16 %v270_v19, %v267_v17  ;;  %v3258_v24 = vpack.c.bf16 %v276_v23, %v273_v22  ;;  %v63_v32 = vld [vmem:[%s3621_s3] sm:$0x7] }
  0x49   :  { %2516 = vmatpush3.bf16.msra.mxu1 %v3216_v53  ;;  %v68_v35 = vrot.slane %v63_v32, %v67_v29  ;;  %v76_v36 = vrot.slane %v63_v32, %v75_v30  ;;  %v72_v37 = vrot.slane %v63_v32, %v71_v33 }
  0x4a   :  { %2491 = vmatpush1.bf16.msra.mxu0 %v3203_v42  ;;  %2517 = vmatprep.subr.bf16.mxu1 %v3103_v0 }
  0x4b   :  { %2493 = vmatprep.subr.bf16.mxu0 %v3209_v45 }
  0x4d   :  { %2519 = vmatpush3.bf16.msra.mxu1 %v3226_v62 }
  0x4e   :  { %2495 = vmatpush1.bf16.msra.mxu0 %v3213_v51  ;;  %2520 = vmatprep.subr.bf16.mxu1 %v3103_v0 }
  0x4f   :  { %2497 = vmatprep.subr.bf16.mxu0 %v3219_v54 }
  0x51   :  { %2522 = vmatpush3.bf16.msra.mxu1 %v3236_v9 }
  0x52   :  { %2499 = vmatpush1.bf16.msra.mxu0 %v3223_v60  ;;  %2523 = vmatprep.subr.bf16.mxu1 %v3103_v0 }
  0x53   :  { %2501 = vmatprep.subr.bf16.mxu0 %v3229_v63 }
  0x55   :  { %2525 = vmatpush3.bf16.msra.mxu1 %v3246_v16 }
  0x56   :  { %2503 = vmatpush1.bf16.msra.mxu0 %v3233_v7  ;;  %2526 = vmatprep.subr.bf16.mxu1 %v3103_v0 }
  0x57   :  { %2505 = vmatprep.subr.bf16.mxu0 %v3239_v10 }
  0x59   :  { %2528 = vmatpush3.bf16.msra.mxu1 %v3252_v21 }
  0x5a   :  { %2507 = vmatpush1.bf16.msra.mxu0 %v3243_v15  ;;  %2529 = vmatprep.subr.bf16.mxu1 %v3103_v0 }
  0x5b   :  { %2533 = vmatprep.subr.bf16.mxu0 %v3177_v13 }
  0x5d   :  { %342 = vmatmul.mubr.f32.vlgmr.msra.gmra.mrb[2].mxu0 %v3104_v1  ;;  %2531 = vmatpush3.bf16.msra.mxu1 %v3258_v24 }
  0x5e   :  { %2535 = vmatpush1.bf16.msra.mxu0 %v3179_v18  ;;  %564 = vmatprep.mubr.f32.mxu0 %v3104_v1 }
  0x5f   :  { %2537 = vmatprep.subr.bf16.mxu0 %v3182_v20  ;;  %2564 = vmatprep.subr.bf16.mxu1 %v3103_v0 }
  0x60   :  { %2222 = vmatmul.mubr.f32.vlgmr.msra.gmra.mrb[2].mxu1 %v3104_v1 }
  0x61   :  { %2566 = vmatpush3.bf16.msra.mxu1 %v3200_v40  ;;  %2256 = vmatprep.mubr.msk.f32.mxu1 %vm3105_vm0, %v3104_v1 }
  0x62   :  { %2539 = vmatpush1.bf16.msra.mxu0 %v3186_v25  ;;  %2567 = vmatprep.subr.bf16.mxu1 %v3103_v0 }
  0x63   :  { %2541 = vmatprep.subr.bf16.mxu0 %v3190_v26 }
  0x65   :  { %2569 = vmatpush3.bf16.msra.mxu1 %v3206_v44 }
  0x66   :  { %2543 = vmatpush1.bf16.msra.mxu0 %v3195_v31  ;;  %2570 = vmatprep.subr.bf16.mxu1 %v3103_v0 }
  0x67   :  { %2545 = vmatprep.subr.bf16.mxu0 %v3198_v34 }
  0x69   :  { %2572 = vmatpush3.bf16.msra.mxu1 %v3216_v53 }
  0x6a   :  { %2547 = vmatpush1.bf16.msra.mxu0 %v3203_v42  ;;  %2573 = vmatprep.subr.bf16.mxu1 %v3103_v0 }
  0x6b   :  { %2549 = vmatprep.subr.bf16.mxu0 %v3209_v45 }
  0x6d   :  { %2575 = vmatpush3.bf16.msra.mxu1 %v3226_v62 }
  0x6e   :  { %2551 = vmatpush1.bf16.msra.mxu0 %v3213_v51  ;;  %2576 = vmatprep.subr.bf16.mxu1 %v3103_v0 }
  0x6f   :  { %2553 = vmatprep.subr.bf16.mxu0 %v3219_v54 }
  0x71   :  { %2578 = vmatpush3.bf16.msra.mxu1 %v3236_v9 }
  0x72   :  { %2555 = vmatpush1.bf16.msra.mxu0 %v3223_v60  ;;  %2579 = vmatprep.subr.bf16.mxu1 %v3103_v0 }
  0x73   :  { %2557 = vmatprep.subr.bf16.mxu0 %v3229_v63 }
  0x75   :  { %2581 = vmatpush3.bf16.msra.mxu1 %v3246_v16 }
  0x76   :  { %2559 = vmatpush1.bf16.msra.mxu0 %v3233_v7  ;;  %2582 = vmatprep.subr.bf16.mxu1 %v3103_v0 }
  0x77   :  { %2561 = vmatprep.subr.bf16.mxu0 %v3239_v10 }
  0x79   :  { %2584 = vmatpush3.bf16.msra.mxu1 %v3252_v21 }
  0x7a   :  { %2563 = vmatpush1.bf16.msra.mxu0 %v3243_v15  ;;  %2585 = vmatprep.subr.bf16.mxu1 %v3103_v0 }
  0x7b   :  { %2589 = vmatprep.subr.bf16.mxu0 %v3177_v13 }
  0x7d   :  { %2587 = vmatpush3.bf16.msra.mxu1 %v3258_v24 }
  0x7e   :  { %2620 = vmatprep.subr.bf16.mxu1 %v3103_v0 }
 0x110   :  { %v150_v38 = vpop.f32.mrb[0].mxu0  ;;  %v221_v39 = vpop.f32.mrb[0].mxu1 }
 0x111   :  { %v151_v41 = vadd.f32 %v150_v38, %v68_v35  ;;  %v152_v43 = vpop.f32.mrb[1].mxu0  ;;  %v222_v46 = vadd.f32 %v221_v39, %v76_v36  ;;  %v2188_v47 = vpop.f32.mrb[1].mxu1 }
 0x112   :  { %v153_v48 = vadd.f32 %v152_v43, %v72_v37 }
 0x113   :  { %225 = vst [vmem:[#allocation2] sm:$0xff] %v151_v41  ;;  %227 = vst [vmem:[#allocation2 + $0x10] sm:$0xff] %v222_v46 }
 0x114   :  { %226 = vst [vmem:[#allocation2 + $0x8] sm:$0xff] %v153_v48 }
 0x11b   :  { %v228_v49 = vld [vmem:[#allocation2] ss:$8 sm:$0x7]  ;;  %v451_v33 = vld [vmem:[#allocation2 + $0x1] ss:$8 sm:$0x7] }
 0x11c   :  { %v426_v52 = vrot.slane %v228_v49, 1  ;;  %v436_v8 = vrot.slane %v228_v49, 2  ;;  %v649_v37 = vrot.slane %v451_v33, 1 }
 0x130   :  { %v343_v50 = vpop.f32.mrb[2].mxu0 }
 0x131   :  { %v345_v55 = vpop.f32.mrb[3].mxu0  ;;  %v418_v3 = vadd.f32 %v343_v50, %v228_v49 }
 0x132   :  { %v428_v56 = vadd.f32 %v426_v52, %v345_v55  ;;  %v659_v52 = vrot.slane %v451_v33, 2 }
 0x133   :  { %v414_v58 = vpop.f32.mrb[2].mxu1  ;;  %v2019_v4 = vmul.f32 -1.442695, %v418_v3 }
 0x134   :  { %v2020_v57 = vmul.f32 -1.442695, %v428_v56  ;;  %v2223_v59 = vpop.f32.mrb[3].mxu1 }
 0x136   :  { %2932 = vpow2.f32 %v2020_v57 }
 0x140   :  { %v2933_v61 = vpop.eup %2932 }
 0x141   :  { %v432_v2 = vadd.f32 1.0, %v2933_v61 }
 0x143   :  { %2934 = vrcp.f32 %v432_v2 }
 0x144   :  { %2936 = vpow2.f32 %v2019_v4 }
 0x14d   :  { %v2935_v5 = vpop.eup %2934 }
 0x14e   :  { %v435_v6 = vmul.f32 %v2935_v5, %v414_v58  ;;  %v2937_v14 = vpop.eup %2936 }
 0x14f   :  { %v422_v17 = vadd.f32 1.0, %v2937_v14 }
 0x150   :  { %v438_v11 = vadd.f32 %v436_v8, %v435_v6 }
 0x152   :  { %v2021_v12 = vmul.f32 -1.442695, %v438_v11 }
 0x154   :  { %2938 = vpow2.f32 %v2021_v12 }
 0x155   :  { %2940 = vrcp.f32 %v422_v17 }
 0x15e   :  { %v2939_v19 = vpop.eup %2938 }
 0x15f   :  { %v442_v22 = vadd.f32 1.0, %v2939_v19  ;;  %v2941_v23 = vpop.eup %2940 }
 0x160   :  { %v446_v27 = vsub.f32 1.0, %v2941_v23  ;;  %v445_v29 = vmul.f32 0.0, %v2941_v23  ;;  %v1122_v23 = vld [vmem:[#allocation7 + $0x8] sm:$0xff] }
 0x161   :  { %2942 = vrcp.f32 %v442_v22 }
 0x16b   :  { %v2943_v28 = vpop.eup %2942 }
 0x16c   :  { %v447_v30 = vmul.f32 %v2943_v28, %v446_v27  ;;  %v1125_v27 = vld [vmem:[#allocation7 + $0x20] sm:$0xff] }
 0x16d   :  { %v3404_v28 = vpack.c.bf16 %v1125_v27, %v1122_v23  ;;  %v1163_v27 = vld [vmem:[#allocation7 + $0x150] sm:$0xff] }
 0x16e   :  { %v3302_v32 = vadd.f32 %v447_v30, %v445_v29  ;;  %v1121_v29 = vld [vmem:[#allocation7] sm:$0xff]  ;;  %v1124_v30 = vld [vmem:[#allocation7 + $0x18] sm:$0xff] }
 0x170   :  { %449 = vst [vmem:[%s3622_s4] sm:$0x1] %v3302_v32  ;;  %565 = vmatmul.mubr.f32.vlgmr.msra.gmra.mrb[4].mxu0 %v3302_v32  ;;  %2257 = vmatmul.mubr.f32.vlgmr.msra.gmra.mrb[4].mxu1 %v3302_v32 }
 0x171   :  { %2591 = vmatpush1.bf16.msra.mxu0 %v3179_v18  ;;  %2622 = vmatpush3.bf16.msra.mxu1 %v3200_v40 }
 0x172   :  { %2593 = vmatprep.subr.bf16.mxu0 %v3182_v20  ;;  %2623 = vmatprep.subr.bf16.mxu1 %v3103_v0 }
 0x173   :  { %787 = vmatprep.mubr.f32.mxu0 %v3104_v1  ;;  %2291 = vmatprep.mubr.msk.f32.mxu1 %vm3105_vm0, %v3104_v1 }
 0x175   :  { %2595 = vmatpush1.bf16.msra.mxu0 %v3186_v25  ;;  %2625 = vmatpush3.bf16.msra.mxu1 %v3206_v44 }
 0x176   :  { %2597 = vmatprep.subr.bf16.mxu0 %v3190_v26  ;;  %2626 = vmatprep.subr.bf16.mxu1 %v3103_v0 }
 0x179   :  { %2599 = vmatpush1.bf16.msra.mxu0 %v3195_v31  ;;  %2628 = vmatpush3.bf16.msra.mxu1 %v3216_v53 }
 0x17a   :  { %2601 = vmatprep.subr.bf16.mxu0 %v3198_v34  ;;  %2629 = vmatprep.subr.bf16.mxu1 %v3103_v0 }
 0x17d   :  { %2603 = vmatpush1.bf16.msra.mxu0 %v3203_v42  ;;  %2631 = vmatpush3.bf16.msra.mxu1 %v3226_v62 }
 0x17e   :  { %2605 = vmatprep.subr.bf16.mxu0 %v3209_v45  ;;  %2632 = vmatprep.subr.bf16.mxu1 %v3103_v0 }
 0x181   :  { %2607 = vmatpush1.bf16.msra.mxu0 %v3213_v51  ;;  %2634 = vmatpush3.bf16.msra.mxu1 %v3236_v9 }
 0x182   :  { %2609 = vmatprep.subr.bf16.mxu0 %v3219_v54  ;;  %2635 = vmatprep.subr.bf16.mxu1 %v3103_v0 }
 0x185   :  { %2611 = vmatpush1.bf16.msra.mxu0 %v3223_v60  ;;  %2637 = vmatpush3.bf16.msra.mxu1 %v3246_v16 }
 0x186   :  { %2613 = vmatprep.subr.bf16.mxu0 %v3229_v63  ;;  %2638 = vmatprep.subr.bf16.mxu1 %v3103_v0 }
 0x189   :  { %2615 = vmatpush1.bf16.msra.mxu0 %v3233_v7  ;;  %2640 = vmatpush3.bf16.msra.mxu1 %v3252_v21 }
 0x18a   :  { %2617 = vmatprep.subr.bf16.mxu0 %v3239_v10  ;;  %2641 = vmatprep.subr.bf16.mxu1 %v3103_v0 }
 0x18d   :  { %2619 = vmatpush1.bf16.msra.mxu0 %v3243_v15  ;;  %2643 = vmatpush3.bf16.msra.mxu1 %v3258_v24 }
 0x18e   :  { %2645 = vmatprep.subr.bf16.mxu0 %v3177_v13  ;;  %2676 = vmatprep.subr.bf16.mxu1 %v3103_v0 }
 0x243   :  { %v566_v35 = vpop.f32.mrb[4].mxu0  ;;  %v637_v36 = vpop.f32.mrb[4].mxu1 }
 0x244   :  { %v568_v38 = vpop.f32.mrb[5].mxu0  ;;  %v2258_v39 = vpop.f32.mrb[5].mxu1  ;;  %v641_v48 = vadd.f32 %v566_v35, %v451_v33  ;;  %v1131_v33 = vld [vmem:[#allocation7 + $0x50] sm:$0xff] }
 0x245   :  { %v651_v41 = vadd.f32 %v649_v37, %v568_v38  ;;  %v1134_v37 = vld [vmem:[#allocation7 + $0x68] sm:$0xff]  ;;  %v1137_v39 = vld [vmem:[#allocation7 + $0x80] sm:$0xff] }
 0x246   :  { %v2022_v49 = vmul.f32 -1.442695, %v641_v48  ;;  %v1138_v48 = vld [vmem:[#allocation7 + $0x88] sm:$0xff] }
 0x247   :  { %v2023_v43 = vmul.f32 -1.442695, %v651_v41  ;;  %v1133_v41 = vld [vmem:[#allocation7 + $0x60] sm:$0xff] }
 0x249   :  { %2944 = vpow2.f32 %v2023_v43  ;;  %v1136_v43 = vld [vmem:[#allocation7 + $0x78] sm:$0xff] }
 0x253   :  { %v2945_v46 = vpop.eup %2944 }
 0x254   :  { %v655_v47 = vadd.f32 1.0, %v2945_v46  ;;  %v3415_v46 = vpack.c.bf16 %v1137_v39, %v1134_v37 }
 0x256   :  { %2946 = vrcp.f32 %v655_v47  ;;  %v1135_v47 = vld [vmem:[#allocation7 + $0x70] sm:$0xff] }
 0x257   :  { %2948 = vpow2.f32 %v2022_v49  ;;  %v1140_v49 = vld [vmem:[#allocation7 + $0x98] sm:$0xff] }
 0x260   :  { %v2947_v50 = vpop.eup %2946 }
 0x261   :  { %v658_v13 = vmul.f32 %v2947_v50, %v637_v36  ;;  %v2949_v57 = vpop.eup %2948  ;;  %v1127_v36 = vld [vmem:[#allocation7 + $0x30] sm:$0xff]  ;;  %v3418_v50 = vpack.c.bf16 %v1136_v43, %v1133_v41 }
 0x262   :  { %v645_v58 = vadd.f32 1.0, %v2949_v57  ;;  %v1142_v57 = vld [vmem:[#allocation7 + $0xa8] sm:$0xff] }
 0x263   :  { %v661_v55 = vadd.f32 %v659_v52, %v658_v13  ;;  %v3420_v52 = vpack.c.bf16 %v1138_v48, %v1135_v47  ;;  %v1143_v13 = vld [vmem:[#allocation7 + $0xb0] sm:$0xff] }
 0x265   :  { %v2024_v56 = vmul.f32 -1.442695, %v661_v55  ;;  %v1139_v55 = vld [vmem:[#allocation7 + $0x90] sm:$0xff] }
 0x267   :  { %2950 = vpow2.f32 %v2024_v56  ;;  %v3423_v56 = vpack.c.bf16 %v1143_v13, %v1140_v49 }
 0x268   :  { %2952 = vrcp.f32 %v645_v58  ;;  %v1141_v58 = vld [vmem:[#allocation7 + $0xa0] sm:$0xff] }
 0x271   :  { %v2951_v59 = vpop.eup %2950 }
 0x272   :  { %v665_v61 = vadd.f32 1.0, %v2951_v59  ;;  %v2953_v2 = vpop.eup %2952  ;;  %v1144_v59 = vld [vmem:[#allocation7 + $0xb8] sm:$0xff] }
 0x273   :  { %v669_v3 = vsub.f32 1.0, %v2953_v2  ;;  %v668_v5 = vmul.f32 %v2953_v2, %v3302_v32  ;;  %v3406_v32 = vpack.c.bf16 %v1124_v30, %v1121_v29  ;;  %v1146_v2 = vld [vmem:[#allocation7 + $0xc8] sm:$0xff] }
 0x274   :  { %2954 = vrcp.f32 %v665_v61  ;;  %v3426_v61 = vpack.c.bf16 %v1144_v59, %v1141_v58  ;;  %v1166_v29 = vld [vmem:[#allocation7 + $0x168] sm:$0xff] }
 0x27e   :  { %v2955_v4 = vpop.eup %2954 }
 0x27f   :  { %v670_v6 = vmul.f32 %v2955_v4, %v669_v3  ;;  %v1149_v3 = vld [vmem:[#allocation7 + $0xe0] sm:$0xff]  ;;  %v1147_v4 = vld [vmem:[#allocation7 + $0xd0] sm:$0xff] }
 0x281   :  { %v3346_v8 = vadd.f32 %v670_v6, %v668_v5  ;;  %v1150_v5 = vld [vmem:[#allocation7 + $0xe8] sm:$0xff]  ;;  %v3430_v6 = vpack.c.bf16 %v1142_v57, %v1139_v55 }
 0x283   :  { %672 = vst [vmem:[%s3622_s4 + $0x1] sm:$0x1] %v3346_v8  ;;  %788 = vmatmul.mubr.f32.vlgmr.msra.gmra.mrb[6].mxu0 %v3346_v8  ;;  %2292 = vmatmul.mubr.f32.vlgmr.msra.gmra.mrb[6].mxu1 %v3346_v8 }
 0x284   :  { %2647 = vmatpush1.bf16.msra.mxu0 %v3179_v18  ;;  %2678 = vmatpush3.bf16.msra.mxu1 %v3200_v40  ;;  %v674_v18 = vld [vmem:[#allocation2 + $0x2] ss:$8 sm:$0x7] }
 0x285   :  { %2649 = vmatprep.subr.bf16.mxu0 %v3182_v20  ;;  %2679 = vmatprep.subr.bf16.mxu1 %v3103_v0 }
 0x286   :  { %1010 = vmatprep.mubr.f32.mxu0 %v3104_v1  ;;  %2326 = vmatprep.mubr.msk.f32.mxu1 %vm3105_vm0, %v3104_v1 }
 0x288   :  { %2651 = vmatpush1.bf16.msra.mxu0 %v3186_v25  ;;  %2681 = vmatpush3.bf16.msra.mxu1 %v3206_v44 }
 0x289   :  { %2653 = vmatprep.subr.bf16.mxu0 %v3190_v26  ;;  %2682 = vmatprep.subr.bf16.mxu1 %v3103_v0  ;;  %v872_v26 = vrot.slane %v674_v18, 1 }
 0x28c   :  { %2655 = vmatpush1.bf16.msra.mxu0 %v3195_v31  ;;  %2684 = vmatpush3.bf16.msra.mxu1 %v3216_v53 }
 0x28d   :  { %2657 = vmatprep.subr.bf16.mxu0 %v3198_v34  ;;  %2685 = vmatprep.subr.bf16.mxu1 %v3103_v0 }
 0x290   :  { %2659 = vmatpush1.bf16.msra.mxu0 %v3203_v42  ;;  %2687 = vmatpush3.bf16.msra.mxu1 %v3226_v62 }
 0x291   :  { %2661 = vmatprep.subr.bf16.mxu0 %v3209_v45  ;;  %2688 = vmatprep.subr.bf16.mxu1 %v3103_v0 }
 0x294   :  { %2663 = vmatpush1.bf16.msra.mxu0 %v3213_v51  ;;  %2690 = vmatpush3.bf16.msra.mxu1 %v3236_v9 }
 0x295   :  { %2665 = vmatprep.subr.bf16.mxu0 %v3219_v54  ;;  %2691 = vmatprep.subr.bf16.mxu1 %v3103_v0 }
 0x298   :  { %2667 = vmatpush1.bf16.msra.mxu0 %v3223_v60  ;;  %2693 = vmatpush3.bf16.msra.mxu1 %v3246_v16 }
 0x299   :  { %2669 = vmatprep.subr.bf16.mxu0 %v3229_v63  ;;  %2694 = vmatprep.subr.bf16.mxu1 %v3103_v0  ;;  %v882_v63 = vrot.slane %v674_v18, 2 }
 0x29c   :  { %2671 = vmatpush1.bf16.msra.mxu0 %v3233_v7  ;;  %2696 = vmatpush3.bf16.msra.mxu1 %v3252_v21 }
 0x29d   :  { %2673 = vmatprep.subr.bf16.mxu0 %v3239_v10  ;;  %2697 = vmatprep.subr.bf16.mxu1 %v3103_v0 }
 0x2a0   :  { %2675 = vmatpush1.bf16.msra.mxu0 %v3243_v15  ;;  %2699 = vmatpush3.bf16.msra.mxu1 %v3258_v24 }
 0x2a1   :  { %2732 = vmatprep.subr.bf16.mxu1 %v3103_v0  ;;  %2701 = vmatprep.subr.bf16.mxu0 %v3404_v28 }
 0x356   :  { %v789_v20 = vpop.f32.mrb[6].mxu0  ;;  %v860_v25 = vpop.f32.mrb[6].mxu1 }
 0x357   :  { %v791_v31 = vpop.f32.mrb[7].mxu0  ;;  %v2293_v34 = vpop.f32.mrb[7].mxu1  ;;  %v864_v54 = vadd.f32 %v789_v20, %v674_v18  ;;  %v1145_v18 = vld [vmem:[#allocation7 + $0xc0] sm:$0xff]  ;;  %v1148_v20 = vld [vmem:[#allocation7 + $0xd8] sm:$0xff] }
 0x358   :  { %v874_v42 = vadd.f32 %v872_v26, %v791_v31  ;;  %v1152_v26 = vld [vmem:[#allocation7 + $0xf8] sm:$0xff]  ;;  %v1155_v31 = vld [vmem:[#allocation7 + $0x110] sm:$0xff]  ;;  %v1153_v34 = vld [vmem:[#allocation7 + $0x100] sm:$0xff] }
 0x359   :  { %v2025_v60 = vmul.f32 -1.442695, %v864_v54  ;;  %v1154_v54 = vld [vmem:[#allocation7 + $0x108] sm:$0xff] }
 0x35a   :  { %v2026_v45 = vmul.f32 -1.442695, %v874_v42  ;;  %v1156_v42 = vld [vmem:[#allocation7 + $0x118] sm:$0xff] }
 0x35c   :  { %2956 = vpow2.f32 %v2026_v45  ;;  %v3440_v45 = vpack.c.bf16 %v1148_v20, %v1145_v18 }
 0x366   :  { %v2957_v51 = vpop.eup %2956 }
 0x367   :  { %v878_v53 = vadd.f32 1.0, %v2957_v51  ;;  %v3443_v51 = vpack.c.bf16 %v1155_v31, %v1152_v26 }
 0x369   :  { %2958 = vrcp.f32 %v878_v53  ;;  %v1151_v53 = vld [vmem:[#allocation7 + $0xf0] sm:$0xff] }
 0x36a   :  { %2960 = vpow2.f32 %v2025_v60  ;;  %v3446_v60 = vpack.c.bf16 %v1156_v42, %v1153_v34 }
 0x373   :  { %v2959_v62 = vpop.eup %2958 }
 0x374   :  { %v881_v7 = vmul.f32 %v2959_v62, %v860_v25  ;;  %v2961_v15 = vpop.eup %2960  ;;  %v3436_v25 = vpack.c.bf16 %v1150_v5, %v1147_v4  ;;  %v1158_v62 = vld [vmem:[#allocation7 + $0x128] sm:$0xff] }
 0x375   :  { %v868_v16 = vadd.f32 1.0, %v2961_v15 }
 0x376   :  { %v884_v9 = vadd.f32 %v882_v63, %v881_v7  ;;  %v1161_v63 = vld [vmem:[#allocation7 + $0x140] sm:$0xff]  ;;  %v1159_v7 = vld [vmem:[#allocation7 + $0x130] sm:$0xff] }
 0x377   :  { %v3453_v15 = vpack.c.bf16 %v1161_v63, %v1158_v62  ;;  %v1349_v62 = vld [vmem:[#allocation7 + $0x28] sm:$0xff] }
 0x378   :  { %v2027_v10 = vmul.f32 -1.442695, %v884_v9  ;;  %v1162_v9 = vld [vmem:[#allocation7 + $0x148] sm:$0xff] }
 0x37a   :  { %2962 = vpow2.f32 %v2027_v10  ;;  %v3450_v10 = vpack.c.bf16 %v1154_v54, %v1151_v53 }
 0x37b   :  { %2964 = vrcp.f32 %v868_v16  ;;  %v1157_v16 = vld [vmem:[#allocation7 + $0x120] sm:$0xff] }
 0x384   :  { %v2963_v21 = vpop.eup %2962 }
 0x385   :  { %v888_v24 = vadd.f32 1.0, %v2963_v21  ;;  %v2965_v11 = vpop.eup %2964  ;;  %v1160_v21 = vld [vmem:[#allocation7 + $0x138] sm:$0xff] }
 0x386   :  { %v892_v12 = vsub.f32 1.0, %v2965_v11  ;;  %v891_v17 = vmul.f32 %v2965_v11, %v3346_v8  ;;  %v3433_v8 = vpack.c.bf16 %v1149_v3, %v1146_v2  ;;  %v1164_v11 = vld [vmem:[#allocation7 + $0x158] sm:$0xff] }
 0x387   :  { %2966 = vrcp.f32 %v888_v24  ;;  %v3456_v24 = vpack.c.bf16 %v1162_v9, %v1159_v7  ;;  %v1352_v7 = vld [vmem:[#allocation7 + $0x40] sm:$0xff]  ;;  %v1355_v9 = vld [vmem:[#allocation7 + $0x58] sm:$0xff] }
 0x391   :  { %v2967_v14 = vpop.eup %2966 }
 0x392   :  { %v893_v19 = vmul.f32 %v2967_v14, %v892_v12  ;;  %v1167_v12 = vld [vmem:[#allocation7 + $0x170] sm:$0xff]  ;;  %v1165_v14 = vld [vmem:[#allocation7 + $0x160] sm:$0xff] }
 0x393   :  { %v3463_v23 = vpack.c.bf16 %v1167_v12, %v1164_v11 }
 0x394   :  { %v3389_v22 = vadd.f32 %v893_v19, %v891_v17  ;;  %v1168_v17 = vld [vmem:[#allocation7 + $0x178] sm:$0xff]  ;;  %v3460_v19 = vpack.c.bf16 %v1160_v21, %v1157_v16  ;;  %v3508_v16 = vpack.c.bf16 %v1355_v9, %v1352_v7 }
 0x395   :  { %v3466_v30 = vpack.c.bf16 %v1168_v17, %v1165_v14  ;;  %v1120_v21 = vld [vmem:[#allocation2 + $0x4] ss:$8 sm:$0x7] }
 0x396   :  { %895 = vst [vmem:[%s3622_s4 + $0x2] sm:$0x1] %v3389_v22  ;;  %1011 = vmatmul.mubr.f32.vlgmr.msra.gmra.mrb[8].mxu0 %v3389_v22  ;;  %2327 = vmatmul.mubr.f32.vlgmr.msra.gmra.mrb[8].mxu1 %v3389_v22  ;;  %v1318_v14 = vrot.slane %v1120_v21, 1 }
 0x397   :  { %2734 = vmatpush3.bf16.msra.mxu1 %v3200_v40  ;;  %1233 = vmatprep.mubr.f32.mxu0 %v3104_v1  ;;  %v1128_v40 = vld [vmem:[#allocation7 + $0x38] sm:$0xff] }
 0x398   :  { %2735 = vmatprep.subr.bf16.mxu1 %v3103_v0  ;;  %2361 = vmatprep.mubr.msk.f32.mxu1 %vm3105_vm0, %v3104_v1  ;;  %v3410_v35 = vpack.c.bf16 %v1131_v33, %v1128_v40  ;;  %v3470_v40 = vpack.c.bf16 %v1166_v29, %v1163_v27  ;;  %v897_v33 = vld [vmem:[#allocation2 + $0x3] ss:$8 sm:$0x7] }
 0x399   :  { %2703 = vmatpush1.bf16.msra.mxu0 %v3406_v32  ;;  %v1095_v37 = vrot.slane %v897_v33, 1  ;;  %v1105_v58 = vrot.slane %v897_v33, 2 }
 0x39a   :  { %2705 = vmatprep.subr.bf16.mxu0 %v3410_v35 }
 0x39b   :  { %2737 = vmatpush3.bf16.msra.mxu1 %v3206_v44  ;;  %v1130_v44 = vld [vmem:[#allocation7 + $0x48] sm:$0xff] }
 0x39c   :  { %2738 = vmatprep.subr.bf16.mxu1 %v3103_v0  ;;  %v3412_v38 = vpack.c.bf16 %v1130_v44, %v1127_v36 }
 0x39e   :  { %2707 = vmatpush1.bf16.msra.mxu0 %v3412_v38 }
 0x39f   :  { %2709 = vmatprep.subr.bf16.mxu0 %v3415_v46  ;;  %2740 = vmatpush3.bf16.msra.mxu1 %v3420_v52 }
 0x3a0   :  { %2741 = vmatprep.subr.bf16.mxu1 %v3103_v0 }
 0x3a2   :  { %2711 = vmatpush1.bf16.msra.mxu0 %v3418_v50 }
 0x3a3   :  { %2713 = vmatprep.subr.bf16.mxu0 %v3423_v56  ;;  %2743 = vmatpush3.bf16.msra.mxu1 %v3426_v61 }
 0x3a4   :  { %2744 = vmatprep.subr.bf16.mxu1 %v3103_v0 }
 0x3a6   :  { %2715 = vmatpush1.bf16.msra.mxu0 %v3430_v6 }
 0x3a7   :  { %2717 = vmatprep.subr.bf16.mxu0 %v3433_v8  ;;  %2746 = vmatpush3.bf16.msra.mxu1 %v3436_v25 }
 0x3a8   :  { %2747 = vmatprep.subr.bf16.mxu1 %v3103_v0 }
 0x3aa   :  { %2719 = vmatpush1.bf16.msra.mxu0 %v3440_v45 }
 0x3ab   :  { %2721 = vmatprep.subr.bf16.mxu0 %v3443_v51  ;;  %2749 = vmatpush3.bf16.msra.mxu1 %v3446_v60 }
 0x3ac   :  { %2750 = vmatprep.subr.bf16.mxu1 %v3103_v0 }
 0x3ae   :  { %2723 = vmatpush1.bf16.msra.mxu0 %v3450_v10 }
 0x3af   :  { %2725 = vmatprep.subr.bf16.mxu0 %v3453_v15  ;;  %2752 = vmatpush3.bf16.msra.mxu1 %v3456_v24 }
 0x3b0   :  { %2753 = vmatprep.subr.bf16.mxu1 %v3103_v0 }
 0x3b2   :  { %2727 = vmatpush1.bf16.msra.mxu0 %v3460_v19 }
 0x3b3   :  { %2729 = vmatprep.subr.bf16.mxu0 %v3463_v23  ;;  %2755 = vmatpush3.bf16.msra.mxu1 %v3466_v30 }
 0x3b4   :  { %2788 = vmatprep.subr.bf16.mxu1 %v3103_v0 }
 0x3b6   :  { %2731 = vmatpush1.bf16.msra.mxu0 %v3470_v40 }
 0x3b7   :  { %2757 = vmatprep.subr.bf16.mxu0 %v3404_v28 }
 0x469   :  { %v1012_v36 = vpop.f32.mrb[8].mxu0  ;;  %v1083_v44 = vpop.f32.mrb[8].mxu1 }
 0x46a   :  { %v1014_v39 = vpop.f32.mrb[9].mxu0  ;;  %v2328_v41 = vpop.f32.mrb[9].mxu1  ;;  %v1087_v13 = vadd.f32 %v1012_v36, %v897_v33 }
 0x46b   :  { %v1097_v43 = vadd.f32 %v1095_v37, %v1014_v39 }
 0x46c   :  { %v2028_v55 = vmul.f32 -1.442695, %v1087_v13 }
 0x46d   :  { %v2029_v47 = vmul.f32 -1.442695, %v1097_v43  ;;  %v1328_v43 = vrot.slane %v1120_v21, 2 }
 0x46f   :  { %2968 = vpow2.f32 %v2029_v47 }
 0x479   :  { %v2969_v48 = vpop.eup %2968 }
 0x47a   :  { %v1101_v49 = vadd.f32 1.0, %v2969_v48 }
 0x47c   :  { %2970 = vrcp.f32 %v1101_v49 }
 0x47d   :  { %2972 = vpow2.f32 %v2028_v55 }
 0x486   :  { %v2971_v57 = vpop.eup %2970 }
 0x487   :  { %v1104_v59 = vmul.f32 %v2971_v57, %v1083_v44  ;;  %v2973_v4 = vpop.eup %2972 }
 0x488   :  { %v1091_v5 = vadd.f32 1.0, %v2973_v4 }
 0x489   :  { %v1107_v2 = vadd.f32 %v1105_v58, %v1104_v59 }
 0x48b   :  { %v2030_v3 = vmul.f32 -1.442695, %v1107_v2 }
 0x48d   :  { %2974 = vpow2.f32 %v2030_v3 }
 0x48e   :  { %2976 = vrcp.f32 %v1091_v5 }
 0x497   :  { %v2975_v18 = vpop.eup %2974 }
 0x498   :  { %v1111_v20 = vadd.f32 1.0, %v2975_v18  ;;  %v2977_v26 = vpop.eup %2976 }
 0x499   :  { %v1115_v31 = vsub.f32 1.0, %v2977_v26  ;;  %v1114_v42 = vmul.f32 %v2977_v26, %v3389_v22  ;;  %v1346_v22 = vld [vmem:[#allocation7 + $0x10] sm:$0xff] }
 0x49a   :  { %2978 = vrcp.f32 %v1111_v20  ;;  %v3505_v63 = vpack.c.bf16 %v1349_v62, %v1346_v22  ;;  %v1343_v20 = vld [vmem:[#allocation2 + $0x5] ss:$8 sm:$0x7] }
 0x4a4   :  { %v2979_v34 = vpop.eup %2978 }
 0x4a5   :  { %v1116_v53 = vmul.f32 %v2979_v34, %v1115_v31  ;;  %v1541_v34 = vrot.slane %v1343_v20, 1 }
 0x4a7   :  { %v3478_v54 = vadd.f32 %v1116_v53, %v1114_v42 }
 0x4a9   :  { %1118 = vst [vmem:[%s3622_s4 + $0x3] sm:$0x1] %v3478_v54  ;;  %1234 = vmatmul.mubr.f32.vlgmr.msra.gmra.mrb[10].mxu0 %v3478_v54  ;;  %2362 = vmatmul.mubr.f32.vlgmr.msra.gmra.mrb[10].mxu1 %v3478_v54 }
 0x4aa   :  { %2759 = vmatpush1.bf16.msra.mxu0 %v3406_v32  ;;  %1456 = vmatprep.mubr.f32.mxu0 %v3104_v1 }
 0x4ab   :  { %2761 = vmatprep.subr.bf16.mxu0 %v3410_v35  ;;  %2396 = vmatprep.mubr.msk.f32.mxu1 %vm3105_vm0, %v3104_v1 }
 0x4ac   :  { %2790 = vmatpush3.bf16.msra.mxu1 %v3505_v63 }
 0x4ad   :  { %2791 = vmatprep.subr.bf16.mxu1 %v3103_v0 }
 0x4ae   :  { %2763 = vmatpush1.bf16.msra.mxu0 %v3412_v38 }
 0x4af   :  { %2765 = vmatprep.subr.bf16.mxu0 %v3415_v46 }
 0x4b0   :  { %2793 = vmatpush3.bf16.msra.mxu1 %v3508_v16 }
 0x4b1   :  { %2794 = vmatprep.subr.bf16.mxu1 %v3103_v0 }
 0x4b2   :  { %2767 = vmatpush1.bf16.msra.mxu0 %v3418_v50 }
 0x4b3   :  { %2769 = vmatprep.subr.bf16.mxu0 %v3423_v56 }
 0x4b4   :  { %2796 = vmatpush3.bf16.msra.mxu1 %v3420_v52 }
 0x4b5   :  { %2797 = vmatprep.subr.bf16.mxu1 %v3103_v0 }
 0x4b6   :  { %2771 = vmatpush1.bf16.msra.mxu0 %v3430_v6 }
 0x4b7   :  { %2773 = vmatprep.subr.bf16.mxu0 %v3433_v8 }
 0x4b8   :  { %2799 = vmatpush3.bf16.msra.mxu1 %v3426_v61 }
 0x4b9   :  { %2800 = vmatprep.subr.bf16.mxu1 %v3103_v0 }
 0x4ba   :  { %2775 = vmatpush1.bf16.msra.mxu0 %v3440_v45 }
 0x4bb   :  { %2777 = vmatprep.subr.bf16.mxu0 %v3443_v51 }
 0x4bc   :  { %2802 = vmatpush3.bf16.msra.mxu1 %v3436_v25 }
 0x4bd   :  { %2803 = vmatprep.subr.bf16.mxu1 %v3103_v0 }
 0x4be   :  { %2779 = vmatpush1.bf16.msra.mxu0 %v3450_v10 }
 0x4bf   :  { %2781 = vmatprep.subr.bf16.mxu0 %v3453_v15 }
 0x4c0   :  { %2805 = vmatpush3.bf16.msra.mxu1 %v3446_v60 }
 0x4c1   :  { %2806 = vmatprep.subr.bf16.mxu1 %v3103_v0 }
 0x4c2   :  { %2783 = vmatpush1.bf16.msra.mxu0 %v3460_v19 }
 0x4c3   :  { %2785 = vmatprep.subr.bf16.mxu0 %v3463_v23 }
 0x4c4   :  { %2808 = vmatpush3.bf16.msra.mxu1 %v3456_v24 }
 0x4c5   :  { %2809 = vmatprep.subr.bf16.mxu1 %v3103_v0 }
 0x4c6   :  { %2787 = vmatpush1.bf16.msra.mxu0 %v3470_v40 }
 0x4c7   :  { %2813 = vmatprep.subr.bf16.mxu0 %v3404_v28 }
 0x4c8   :  { %2811 = vmatpush3.bf16.msra.mxu1 %v3466_v30 }
 0x4c9   :  { %2844 = vmatprep.subr.bf16.mxu1 %v3103_v0 }
 0x57c   :  { %v1235_v11 = vpop.f32.mrb[10].mxu0  ;;  %v1306_v12 = vpop.f32.mrb[10].mxu1 }
 0x57d   :  { %v1237_v17 = vpop.f32.mrb[11].mxu0  ;;  %v2363_v27 = vpop.f32.mrb[11].mxu1  ;;  %v1310_v37 = vadd.f32 %v1235_v11, %v1120_v21 }
 0x57e   :  { %v1320_v29 = vadd.f32 %v1318_v14, %v1237_v17 }
 0x57f   :  { %v2031_v39 = vmul.f32 -1.442695, %v1310_v37 }
 0x580   :  { %v2032_v33 = vmul.f32 -1.442695, %v1320_v29 }
 0x582   :  { %2980 = vpow2.f32 %v2032_v33 }
 0x58c   :  { %v2981_v36 = vpop.eup %2980 }
 0x58d   :  { %v1324_v44 = vadd.f32 1.0, %v2981_v36 }
 0x58f   :  { %2982 = vrcp.f32 %v1324_v44 }
 0x590   :  { %2984 = vpow2.f32 %v2031_v39 }
 0x599   :  { %v2983_v41 = vpop.eup %2982 }
 0x59a   :  { %v1327_v47 = vmul.f32 %v2983_v41, %v1306_v12  ;;  %v2985_v13 = vpop.eup %2984  ;;  %v1551_v12 = vrot.slane %v1343_v20, 2 }
 0x59b   :  { %v1314_v55 = vadd.f32 1.0, %v2985_v13  ;;  %v1789_v13 = vld [vmem:[#allocation2 + $0x7] ss:$8 sm:$0x7] }
 0x59c   :  { %v1330_v48 = vadd.f32 %v1328_v43, %v1327_v47 }
 0x59e   :  { %v2033_v49 = vmul.f32 -1.442695, %v1330_v48 }
 0x5a0   :  { %2986 = vpow2.f32 %v2033_v49 }
 0x5a1   :  { %2988 = vrcp.f32 %v1314_v55 }
 0x5aa   :  { %v2987_v57 = vpop.eup %2986 }
 0x5ab   :  { %v1334_v58 = vadd.f32 1.0, %v2987_v57  ;;  %v2989_v59 = vpop.eup %2988 }
 0x5ac   :  { %v1338_v2 = vsub.f32 1.0, %v2989_v59  ;;  %v1337_v4 = vmul.f32 %v2989_v59, %v3478_v54 }
 0x5ad   :  { %2990 = vrcp.f32 %v1334_v58  ;;  %v1987_v58 = vrot.slane %v1789_v13, 1 }
 0x5b7   :  { %v2991_v3 = vpop.eup %2990 }
 0x5b8   :  { %v1339_v5 = vmul.f32 %v2991_v3, %v1338_v2 }
 0x5ba   :  { %v3526_v18 = vadd.f32 %v1339_v5, %v1337_v4 }
 0x5bc   :  { %1341 = vst [vmem:[%s3622_s4 + $0x4] sm:$0x1] %v3526_v18  ;;  %1457 = vmatmul.mubr.f32.vlgmr.msra.gmra.mrb[12].mxu0 %v3526_v18  ;;  %2397 = vmatmul.mubr.f32.vlgmr.msra.gmra.mrb[12].mxu1 %v3526_v18 }
 0x5bd   :  { %2815 = vmatpush1.bf16.msra.mxu0 %v3406_v32  ;;  %2846 = vmatpush3.bf16.msra.mxu1 %v3505_v63 }
 0x5be   :  { %2817 = vmatprep.subr.bf16.mxu0 %v3410_v35  ;;  %2847 = vmatprep.subr.bf16.mxu1 %v3103_v0 }
 0x5bf   :  { %1679 = vmatprep.mubr.f32.mxu0 %v3104_v1  ;;  %2431 = vmatprep.mubr.msk.f32.mxu1 %vm3105_vm0, %v3104_v1 }
 0x5c1   :  { %2819 = vmatpush1.bf16.msra.mxu0 %v3412_v38  ;;  %2849 = vmatpush3.bf16.msra.mxu1 %v3508_v16 }
 0x5c2   :  { %2821 = vmatprep.subr.bf16.mxu0 %v3415_v46  ;;  %2850 = vmatprep.subr.bf16.mxu1 %v3103_v0 }
 0x5c5   :  { %2823 = vmatpush1.bf16.msra.mxu0 %v3418_v50  ;;  %2852 = vmatpush3.bf16.msra.mxu1 %v3420_v52 }
 0x5c6   :  { %2825 = vmatprep.subr.bf16.mxu0 %v3423_v56  ;;  %2853 = vmatprep.subr.bf16.mxu1 %v3103_v0 }
 0x5c9   :  { %2827 = vmatpush1.bf16.msra.mxu0 %v3430_v6  ;;  %2855 = vmatpush3.bf16.msra.mxu1 %v3426_v61 }
 0x5ca   :  { %2829 = vmatprep.subr.bf16.mxu0 %v3433_v8  ;;  %2856 = vmatprep.subr.bf16.mxu1 %v3103_v0 }
 0x5cd   :  { %2831 = vmatpush1.bf16.msra.mxu0 %v3440_v45  ;;  %2858 = vmatpush3.bf16.msra.mxu1 %v3436_v25 }
 0x5ce   :  { %2833 = vmatprep.subr.bf16.mxu0 %v3443_v51  ;;  %2859 = vmatprep.subr.bf16.mxu1 %v3103_v0 }
 0x5d1   :  { %2835 = vmatpush1.bf16.msra.mxu0 %v3450_v10  ;;  %2861 = vmatpush3.bf16.msra.mxu1 %v3446_v60 }
 0x5d2   :  { %2837 = vmatprep.subr.bf16.mxu0 %v3453_v15  ;;  %2862 = vmatprep.subr.bf16.mxu1 %v3103_v0 }
 0x5d5   :  { %2839 = vmatpush1.bf16.msra.mxu0 %v3460_v19  ;;  %2864 = vmatpush3.bf16.msra.mxu1 %v3456_v24 }
 0x5d6   :  { %2841 = vmatprep.subr.bf16.mxu0 %v3463_v23  ;;  %2865 = vmatprep.subr.bf16.mxu1 %v3103_v0 }
 0x5d9   :  { %2843 = vmatpush1.bf16.msra.mxu0 %v3470_v40  ;;  %2867 = vmatpush3.bf16.msra.mxu1 %v3466_v30 }
 0x5da   :  { %2869 = vmatprep.subr.bf16.mxu0 %v3404_v28  ;;  %2900 = vmatprep.subr.bf16.mxu1 %v3103_v0 }
 0x68f   :  { %v1458_v26 = vpop.f32.mrb[12].mxu0  ;;  %v1529_v31 = vpop.f32.mrb[12].mxu1 }
 0x690   :  { %v1460_v42 = vpop.f32.mrb[13].mxu0  ;;  %v2398_v53 = vpop.f32.mrb[13].mxu1  ;;  %v1533_v9 = vadd.f32 %v1458_v26, %v1343_v20 }
 0x691   :  { %v1543_v54 = vadd.f32 %v1541_v34, %v1460_v42  ;;  %v1997_v34 = vrot.slane %v1789_v13, 2 }
 0x692   :  { %v2034_v21 = vmul.f32 -1.442695, %v1533_v9 }
 0x693   :  { %v2035_v22 = vmul.f32 -1.442695, %v1543_v54 }
 0x695   :  { %2992 = vpow2.f32 %v2035_v22 }
 0x69f   :  { %v2993_v62 = vpop.eup %2992 }
 0x6a0   :  { %v1547_v7 = vadd.f32 1.0, %v2993_v62 }
 0x6a2   :  { %2994 = vrcp.f32 %v1547_v7 }
 0x6a3   :  { %2996 = vpow2.f32 %v2034_v21 }
 0x6ac   :  { %v2995_v11 = vpop.eup %2994 }
 0x6ad   :  { %v1550_v28 = vmul.f32 %v2995_v11, %v1529_v31  ;;  %v2997_v27 = vpop.eup %2996 }
 0x6ae   :  { %v1537_v29 = vadd.f32 1.0, %v2997_v27 }
 0x6af   :  { %v1553_v14 = vadd.f32 %v1551_v12, %v1550_v28 }
 0x6b1   :  { %v2036_v17 = vmul.f32 -1.442695, %v1553_v14 }
 0x6b3   :  { %2998 = vpow2.f32 %v2036_v17 }
 0x6b4   :  { %3000 = vrcp.f32 %v1537_v29 }
 0x6bd   :  { %v2999_v33 = vpop.eup %2998 }
 0x6be   :  { %v1557_v36 = vadd.f32 1.0, %v2999_v33  ;;  %v3001_v44 = vpop.eup %3000 }
 0x6bf   :  { %v1561_v37 = vsub.f32 1.0, %v3001_v44  ;;  %v1560_v41 = vmul.f32 %v3001_v44, %v3526_v18 }
 0x6c0   :  { %3002 = vrcp.f32 %v1557_v36 }
 0x6ca   :  { %v3003_v39 = vpop.eup %3002 }
 0x6cb   :  { %v1562_v43 = vmul.f32 %v3003_v39, %v1561_v37 }
 0x6cd   :  { %v3570_v47 = vadd.f32 %v1562_v43, %v1560_v41 }
 0x6cf   :  { %1564 = vst [vmem:[%s3622_s4 + $0x5] sm:$0x1] %v3570_v47  ;;  %1680 = vmatmul.mubr.f32.vlgmr.msra.gmra.mrb[14].mxu0 %v3570_v47  ;;  %2432 = vmatmul.mubr.f32.vlgmr.msra.gmra.mrb[14].mxu1 %v3570_v47 }
 0x6d0   :  { %2871 = vmatpush1.bf16.msra.mxu0 %v3406_v32  ;;  %2902 = vmatpush3.bf16.msra.mxu1 %v3505_v63 }
 0x6d1   :  { %2873 = vmatprep.subr.bf16.mxu0 %v3410_v35  ;;  %2903 = vmatprep.subr.bf16.mxu1 %v3103_v0 }
 0x6d2   :  { %1902 = vmatprep.mubr.f32.mxu0 %v3104_v1  ;;  %2466 = vmatprep.mubr.msk.f32.mxu1 %vm3105_vm0, %v3104_v1  ;;  %v1566_v1 = vld [vmem:[#allocation2 + $0x6] ss:$8 sm:$0x7] }
 0x6d4   :  { %2875 = vmatpush1.bf16.msra.mxu0 %v3412_v38  ;;  %2905 = vmatpush3.bf16.msra.mxu1 %v3508_v16  ;;  %v1764_v38 = vrot.slane %v1566_v1, 1 }
 0x6d5   :  { %2877 = vmatprep.subr.bf16.mxu0 %v3415_v46  ;;  %2906 = vmatprep.subr.bf16.mxu1 %v3103_v0 }
 0x6d8   :  { %2879 = vmatpush1.bf16.msra.mxu0 %v3418_v50  ;;  %2908 = vmatpush3.bf16.msra.mxu1 %v3420_v52 }
 0x6d9   :  { %2881 = vmatprep.subr.bf16.mxu0 %v3423_v56  ;;  %2909 = vmatprep.subr.bf16.mxu1 %v3103_v0 }
 0x6dc   :  { %2883 = vmatpush1.bf16.msra.mxu0 %v3430_v6  ;;  %2911 = vmatpush3.bf16.msra.mxu1 %v3426_v61 }
 0x6dd   :  { %2885 = vmatprep.subr.bf16.mxu0 %v3433_v8  ;;  %2912 = vmatprep.subr.bf16.mxu1 %v3103_v0 }
 0x6e0   :  { %2887 = vmatpush1.bf16.msra.mxu0 %v3440_v45  ;;  %2914 = vmatpush3.bf16.msra.mxu1 %v3436_v25  ;;  %v1774_v45 = vrot.slane %v1566_v1, 2 }
 0x6e1   :  { %2889 = vmatprep.subr.bf16.mxu0 %v3443_v51  ;;  %2915 = vmatprep.subr.bf16.mxu1 %v3103_v0 }
 0x6e4   :  { %2891 = vmatpush1.bf16.msra.mxu0 %v3450_v10  ;;  %2917 = vmatpush3.bf16.msra.mxu1 %v3446_v60 }
 0x6e5   :  { %2893 = vmatprep.subr.bf16.mxu0 %v3453_v15  ;;  %2918 = vmatprep.subr.bf16.mxu1 %v3103_v0 }
 0x6e8   :  { %2895 = vmatpush1.bf16.msra.mxu0 %v3460_v19  ;;  %2920 = vmatpush3.bf16.msra.mxu1 %v3456_v24 }
 0x6e9   :  { %2897 = vmatprep.subr.bf16.mxu0 %v3463_v23  ;;  %2921 = vmatprep.subr.bf16.mxu1 %v3103_v0 }
 0x6ec   :  { %2899 = vmatpush1.bf16.msra.mxu0 %v3470_v40  ;;  %2923 = vmatpush3.bf16.msra.mxu1 %v3466_v30 }
 0x7a2   :  { %v1681_v32 = vpop.f32.mrb[14].mxu0  ;;  %v1752_v35 = vpop.f32.mrb[14].mxu1 }
 0x7a3   :  { %v1683_v46 = vpop.f32.mrb[15].mxu0  ;;  %v2433_v50 = vpop.f32.mrb[15].mxu1  ;;  %v1756_v8 = vadd.f32 %v1681_v32, %v1566_v1 }
 0x7a4   :  { %v1766_v52 = vadd.f32 %v1764_v38, %v1683_v46 }
 0x7a5   :  { %v2037_v25 = vmul.f32 -1.442695, %v1756_v8 }
 0x7a6   :  { %v2038_v56 = vmul.f32 -1.442695, %v1766_v52 }
 0x7a8   :  { %3004 = vpow2.f32 %v2038_v56 }
 0x7b2   :  { %v3005_v61 = vpop.eup %3004 }
 0x7b3   :  { %v1770_v6 = vadd.f32 1.0, %v3005_v61 }
 0x7b5   :  { %3006 = vrcp.f32 %v1770_v6 }
 0x7b6   :  { %3008 = vpow2.f32 %v2037_v25 }
 0x7bf   :  { %v3007_v0 = vpop.eup %3006 }
 0x7c0   :  { %v1773_v51 = vmul.f32 %v3007_v0, %v1752_v35  ;;  %v3009_v15 = vpop.eup %3008 }
 0x7c1   :  { %v1760_v24 = vadd.f32 1.0, %v3009_v15 }
 0x7c2   :  { %v1776_v60 = vadd.f32 %v1774_v45, %v1773_v51 }
 0x7c4   :  { %v2039_v10 = vmul.f32 -1.442695, %v1776_v60 }
 0x7c6   :  { %3010 = vpow2.f32 %v2039_v10 }
 0x7c7   :  { %3012 = vrcp.f32 %v1760_v24 }
 0x7d0   :  { %v3011_v19 = vpop.eup %3010 }
 0x7d1   :  { %v1780_v23 = vadd.f32 1.0, %v3011_v19  ;;  %v3013_v30 = vpop.eup %3012 }
 0x7d2   :  { %v1784_v40 = vsub.f32 1.0, %v3013_v30  ;;  %v1783_v16 = vmul.f32 %v3013_v30, %v3570_v47 }
 0x7d3   :  { %3014 = vrcp.f32 %v1780_v23 }
 0x7dd   :  { %v3015_v63 = vpop.eup %3014 }
 0x7de   :  { %v1785_v48 = vmul.f32 %v3015_v63, %v1784_v40 }
 0x7e0   :  { %v1786_v49 = vadd.f32 %v1785_v48, %v1783_v16 }
 0x7e2   :  { %1787 = vst [vmem:[%s3622_s4 + $0x6] sm:$0x1] %v1786_v49  ;;  %1903 = vmatmul.mubr.f32.vlgmr.msra.gmra.mrb[16].mxu0 %v1786_v49  ;;  %2467 = vmatmul.mubr.f32.vlgmr.msra.gmra.mrb[16].mxu1 %v1786_v49 }
 0x8b5   :  { %v1904_v55 = vpop.f32.mrb[16].mxu0  ;;  %v1975_v57 = vpop.f32.mrb[16].mxu1 }
 0x8b6   :  { %v1906_v59 = vpop.f32.mrb[17].mxu0  ;;  %v2468_v2 = vpop.f32.mrb[17].mxu1  ;;  %v1979_v20 = vadd.f32 %v1904_v55, %v1789_v13 }
 0x8b7   :  { %v1989_v3 = vadd.f32 %v1987_v58, %v1906_v59 }
 0x8b8   :  { %v2040_v26 = vmul.f32 -1.442695, %v1979_v20 }
 0x8b9   :  { %v2041_v4 = vmul.f32 -1.442695, %v1989_v3 }
 0x8bb   :  { %3016 = vpow2.f32 %v2041_v4 }
 0x8c5   :  { %v3017_v5 = vpop.eup %3016 }
 0x8c6   :  { %v1993_v18 = vadd.f32 1.0, %v3017_v5 }
 0x8c8   :  { %3018 = vrcp.f32 %v1993_v18 }
 0x8c9   :  { %3020 = vpow2.f32 %v2040_v26 }
 0x8d2   :  { %v3019_v31 = vpop.eup %3018 }
 0x8d3   :  { %v1996_v42 = vmul.f32 %v3019_v31, %v1975_v57  ;;  %v3021_v22 = vpop.eup %3020 }
 0x8d4   :  { %v1983_v62 = vadd.f32 1.0, %v3021_v22 }
 0x8d5   :  { %v1999_v53 = vadd.f32 %v1997_v34, %v1996_v42 }
 0x8d7   :  { %v2042_v54 = vmul.f32 -1.442695, %v1999_v53 }
 0x8d9   :  { %3022 = vpow2.f32 %v2042_v54 }
 0x8da   :  { %3024 = vrcp.f32 %v1983_v62 }
 0x8e3   :  { %v3023_v7 = vpop.eup %3022 }
 0x8e4   :  { %v2003_v9 = vadd.f32 1.0, %v3023_v7  ;;  %v3025_v21 = vpop.eup %3024 }
 0x8e5   :  { %v2007_v11 = vsub.f32 1.0, %v3025_v21  ;;  %v2006_v28 = vmul.f32 %v3025_v21, %v1786_v49 }
 0x8e6   :  { %3026 = vrcp.f32 %v2003_v9 }
 0x8f0   :  { %v3027_v12 = vpop.eup %3026 }
 0x8f1   :  { %v2008_v14 = vmul.f32 %v3027_v12, %v2007_v11 }
 0x8f3   :  { %v2009_v17 = vadd.f32 %v2008_v14, %v2006_v28 }
 0x8f5   :  { %2010 = vst [vmem:[%s3622_s4 + $0x7] sm:$0x1] %v2009_v17 }
 0x8f6   :  { %2015 = vsyncpa [#allocation4], 1 }
 0x8f7   :  { %2016 = vsyncpa [#allocation6], 1 }

</bundles_post_ra>
